<compile_context>
chip_gen: v7x
topology: tpu7x:2x2x1
jax: 0.10.0
libtpu: 0.0.40
codegen_flags: <defaults>
</compile_context>

<pallas_src>
import jax
import jax.numpy as jnp
from jax import lax
from jax.experimental import pallas as pl
from jax.experimental.pallas import tpu as pltpu


NPAD = 128  # lane-dense padded width for the final 11-way softmax output


def _full_spec(x):
    """BlockSpec covering the whole array (single grid step)."""
    return pl.BlockSpec(x.shape, lambda i, _n=x.ndim: (0,) * _n)


# ---------------------------------------------------------------------------
# Kernel 1: PositionalBox + PositionalRecipe + mid0 + (emb*rec + emb) + mid1
#           + hoisted LSTM-layer-0 input projection, all fused.
# Row order is batch-major: row index = b*T + t; box rows are slot-major on top.
# ---------------------------------------------------------------------------
def _embed_mlp_kernel(x_ref, bw_ref, bb_ref, bp_ref,
                      rec_ref, rw_ref, rb_ref, rp_ref,
                      m0w_ref, m0b_ref, m1w_ref, m1b_ref,
                      wih0_ref, b0_ref, o_ref):
    S = bp_ref.shape[0]
    D = bw_ref.shape[1]
    M = x_ref.shape[0] // S
    B = rec_ref.shape[0]
    T = M // B

    # PositionalBox: one big MXU matmul (the /255 is folded into bw).
    h = jnp.dot(x_ref[...], bw_ref[...], preferred_element_type=jnp.float32)
    h = h.reshape(S, M, D) + bb_ref[...] + bp_ref[...][:, None, :]
    boxes_emb = jnp.sum(jnp.maximum(h, 0.0), axis=0)               # (M, D)

    # PositionalRecipe (tiny): 9 slots of (B, 10) @ (10, D).
    R = rec_ref.shape[1]
    rec_emb = jnp.zeros((B, D), jnp.float32)
    for s in range(R):                                             # static, 9 iters
        rh = jnp.dot(rec_ref[:, s, :], rw_ref[...],
                     preferred_element_type=jnp.float32)
        rh = rh + rb_ref[...] + rp_ref[s:s + 1, :]
        rec_emb = rec_emb + jnp.maximum(rh, 0.0)

    # mid0 -> emb*rec + emb -> mid1 (all in VMEM, no HBM round trips).
    e = jnp.dot(boxes_emb.astype(jnp.bfloat16), m0w_ref[...],
                preferred_element_type=jnp.float32) + m0b_ref[...]
    e = jnp.maximum(e, 0.0)
    e3 = e.reshape(B, T, D)
    e3 = e3 * rec_emb[:, None, :] + e3
    e = jnp.dot(e3.reshape(M, D).astype(jnp.bfloat16), m1w_ref[...],
                preferred_element_type=jnp.float32) + m1b_ref[...]
    e = jnp.maximum(e, 0.0)

    # Hoisted LSTM layer-0 input gates: X @ Wih0 + (b_ih0 + b_hh0).
    o_ref[...] = jnp.dot(e.astype(jnp.bfloat16), wih0_ref[...],
                         preferred_element_type=jnp.float32) + b0_ref[...]


def fused_embed_mlp(x_slots, plan, params):
    S = params['box_pos'].shape[0]
    M = x_slots.shape[0] // S
    D = params['box_b'].shape[1]
    args = (x_slots, params['box_w'], params['box_b'], params['box_pos'],
            plan, params['rec_w'], params['rec_b'], params['rec_pos'],
            params['mid0_w'], params['mid0_b'],
            params['mid1_w'], params['mid1_b'],
            params['lstm0_wih'], params['lstm0_b'])
    return pl.pallas_call(
        _embed_mlp_kernel,
        out_shape=jax.ShapeDtypeStruct((M, 4 * D), jnp.float32),
        grid=(1,),
        in_specs=[_full_spec(a) for a in args],
        out_specs=pl.BlockSpec((M, 4 * D), lambda i: (0, 0)),
        compiler_params=pltpu.CompilerParams(
            dimension_semantics=("arbitrary",)),
    )(*args)


# ---------------------------------------------------------------------------
# Kernel 2: both LSTM layers (PyTorch gate order i, f, g, o) + final linear +
#           softmax, fused.  Time-major input/output; h/c states in VMEM.
# gates_x0 already contains X @ Wih0 + combined layer-0 bias.
# ---------------------------------------------------------------------------
def _lstm_head_kernel(gx_ref, whh0_ref, wih1_ref, whh1_ref, b1_ref,
                      wf_ref, bf_ref, o_ref, h0_sc, c0_sc, h1_sc, c1_sc):
    T = gx_ref.shape[0]
    D = whh0_ref.shape[0]

    h0_sc[...] = jnp.zeros_like(h0_sc)
    c0_sc[...] = jnp.zeros_like(c0_sc)
    h1_sc[...] = jnp.zeros_like(h1_sc)
    c1_sc[...] = jnp.zeros_like(c1_sc)

    def step(t, carry):
        # ---- layer 0 (input projection precomputed) ----
        g0 = gx_ref[t] + jnp.dot(h0_sc[...].astype(jnp.bfloat16), whh0_ref[...],
                                 preferred_element_type=jnp.float32)
        i0 = jax.nn.sigmoid(g0[:, 0 * D:1 * D])
        f0 = jax.nn.sigmoid(g0[:, 1 * D:2 * D])
        gg0 = jnp.tanh(g0[:, 2 * D:3 * D])
        o0 = jax.nn.sigmoid(g0[:, 3 * D:4 * D])
        c0 = f0 * c0_sc[...] + i0 * gg0
        h0 = o0 * jnp.tanh(c0)
        c0_sc[...] = c0
        h0_sc[...] = h0

        # ---- layer 1 ----
        g1 = (jnp.dot(h0.astype(jnp.bfloat16), wih1_ref[...],
                      preferred_element_type=jnp.float32)
              + jnp.dot(h1_sc[...].astype(jnp.bfloat16), whh1_ref[...],
                        preferred_element_type=jnp.float32)
              + b1_ref[...])
        i1 = jax.nn.sigmoid(g1[:, 0 * D:1 * D])
        f1 = jax.nn.sigmoid(g1[:, 1 * D:2 * D])
        gg1 = jnp.tanh(g1[:, 2 * D:3 * D])
        o1 = jax.nn.sigmoid(g1[:, 3 * D:4 * D])
        c1 = f1 * c1_sc[...] + i1 * gg1
        h1 = o1 * jnp.tanh(c1)
        c1_sc[...] = c1
        h1_sc[...] = h1

        # ---- final linear (padded to 128 lanes) + softmax ----
        logits = jnp.dot(h1.astype(jnp.bfloat16), wf_ref[...],
                         preferred_element_type=jnp.float32) + bf_ref[...]
        m = jnp.max(logits, axis=-1, keepdims=True)
        e = jnp.exp(logits - m)
        o_ref[t] = e / jnp.sum(e, axis=-1, keepdims=True)
        return carry

    lax.fori_loop(0, T, step, 0, unroll=True)


def lstm_head(gates_tm, params):
    T, B, G = gates_tm.shape
    D = G // 4
    args = (gates_tm, params['lstm0_whh'], params['lstm1_wih'],
            params['lstm1_whh'], params['lstm1_b'],
            params['final_w'], params['final_b'])
    return pl.pallas_call(
        _lstm_head_kernel,
        out_shape=jax.ShapeDtypeStruct((T, B, NPAD), jnp.float32),
        grid=(1,),
        in_specs=[_full_spec(a) for a in args],
        out_specs=pl.BlockSpec((T, B, NPAD), lambda i: (0, 0, 0)),
        scratch_shapes=[pltpu.VMEM((B, D), jnp.float32) for _ in range(4)],
        compiler_params=pltpu.CompilerParams(
            dimension_semantics=("arbitrary",)),
    )(*args)


# ---------------------------------------------------------------------------
# Parameters (deterministic synthetic init) + full forward pass.
# ---------------------------------------------------------------------------
def init_params(key, *, dim=128, box_num=9, num_stages=11, box_c=3, box_h=20,
                slot_w=20, recipe_len=9, recipe_dim=10):
    feat = box_c * box_h * slot_w
    ks = jax.random.split(key, 12)

    def w(k, fan_in, fan_out):
        return (jax.random.normal(k, (fan_in, fan_out), jnp.float32)
                / jnp.sqrt(jnp.float32(fan_in)))

    final_w = jnp.pad(w(ks[10], dim, num_stages),
                      ((0, 0), (0, NPAD - num_stages)))
    final_b = jnp.concatenate(
        [jnp.zeros((1, num_stages), jnp.float32),
         jnp.full((1, NPAD - num_stages), -1e30, jnp.float32)], axis=1)

    return {
        # /255 pixel normalization folded into the PositionalBox weight.
        'box_w': (w(ks[0], feat, dim) / 255.0).astype(jnp.bfloat16),
        'box_b': jnp.zeros((1, dim), jnp.float32),
        'box_pos': 0.02 * jax.random.normal(ks[1], (box_num, dim), jnp.float32),
        'rec_w': w(ks[2], recipe_dim, dim),
        'rec_b': jnp.zeros((1, dim), jnp.float32),
        'rec_pos': 0.02 * jax.random.normal(ks[3], (recipe_len, dim), jnp.float32),
        'mid0_w': w(ks[4], dim, dim).astype(jnp.bfloat16),
        'mid0_b': jnp.zeros((1, dim), jnp.float32),
        'mid1_w': w(ks[5], dim, dim).astype(jnp.bfloat16),
        'mid1_b': jnp.zeros((1, dim), jnp.float32),
        # TODO(synk): PyTorch nn.LSTM has separate b_ih/b_hh; store their SUM here
        # when porting real weights (gate order i, f, g, o; weights transposed).
        'lstm0_wih': w(ks[6], dim, 4 * dim).astype(jnp.bfloat16),
        'lstm0_whh': w(ks[7], dim, 4 * dim).astype(jnp.bfloat16),
        'lstm0_b': jnp.zeros((1, 4 * dim), jnp.float32),
        'lstm1_wih': w(ks[8], dim, 4 * dim).astype(jnp.bfloat16),
        'lstm1_whh': w(ks[9], dim, 4 * dim).astype(jnp.bfloat16),
        'lstm1_b': jnp.zeros((1, 4 * dim), jnp.float32),
        'final_w': final_w.astype(jnp.bfloat16),
        'final_b': final_b,
    }


def minecraft_stage_forward(params, inputs, *, box_num=9, num_stages=11,
                            slot_w=20):
    box = inputs['box']                      # (B, T, H, W, C)
    plan = inputs['plan'].astype(jnp.float32)  # (B, recipe_len, recipe_dim)
    B, T, H, W, C = box.shape
    S = box_num
    D = params['box_b'].shape[1]

    # boxes[..., :20*S, :] / 255 ; NCHW permute ; per-slot width-20 split+flatten
    # -> done as ONE transpose (the /255 is folded into box_w at init).
    b6 = box[..., :S * slot_w, :].reshape(B, T, H, S, slot_w, C)
    slots = jnp.transpose(b6, (3, 0, 1, 5, 2, 4))        # (S, B, T, C, H, 20)
    x_slots = slots.reshape(S * B * T, C * H * slot_w).astype(jnp.bfloat16)

    # Kernel 1: fused embeddings + mid MLP + hoisted layer-0 input gates.
    gates_x0 = fused_embed_mlp(x_slots, plan, params)     # (B*T, 4D)
    gates_tm = jnp.transpose(gates_x0.reshape(B, T, 4 * D), (1, 0, 2))

    # Kernel 2: fused 2-layer LSTM + final linear + softmax (lane-padded).
    probs_tm = lstm_head(gates_tm, params)                # (T, B, NPAD)
    probs = jnp.transpose(probs_tm, (1, 0, 2))[:, :, :num_stages]
    return probs                                          # (B, T, num_stages)


if __name__ == "__main__":
    B, T, H, W, C = 2, 8, 20, 200, 3          # box image; width sliced to 180
    DIM, NUM_STAGES = 128, 11

    key = jax.random.PRNGKey(0)
    k_box, k_plan = jax.random.split(key, 2)
    box = jax.random.uniform(k_box, (B, T, H, W, C), jnp.float32, 0.0, 255.0)
    plan = jax.random.uniform(k_plan, (B, 9, 10), jnp.float32)

    params = init_params(jax.random.PRNGKey(42), dim=DIM, num_stages=NUM_STAGES)

    out = minecraft_stage_forward(params, {'box': box, 'plan': plan},
                                  num_stages=NUM_STAGES)
    out = jax.block_until_ready(out)
    assert out.shape == (B, T, NUM_STAGES)
    assert bool(jnp.all(jnp.isfinite(out)))
    # softmax rows sum to 1 (padded logit lanes carry -1e30 bias -> exp == 0)
    assert bool(jnp.allclose(jnp.sum(out, axis=-1), 1.0, atol=1e-5))
    print("KERNEL_OK")
</pallas_src>

<mosaic_0001>
module attributes {stable_mosaic.version = 11 : i64} {
  func.func @_embed_mlp_kernel(%arg0: i32, %arg1: memref<144x1200xbf16, #tpu.memory_space<vmem>>, %arg2: memref<1200x128xbf16, #tpu.memory_space<vmem>>, %arg3: memref<1x128xf32, #tpu.memory_space<vmem>>, %arg4: memref<9x128xf32, #tpu.memory_space<vmem>>, %arg5: memref<2x9x10xf32, #tpu.memory_space<vmem>>, %arg6: memref<10x128xf32, #tpu.memory_space<vmem>>, %arg7: memref<1x128xf32, #tpu.memory_space<vmem>>, %arg8: memref<9x128xf32, #tpu.memory_space<vmem>>, %arg9: memref<128x128xbf16, #tpu.memory_space<vmem>>, %arg10: memref<1x128xf32, #tpu.memory_space<vmem>>, %arg11: memref<128x128xbf16, #tpu.memory_space<vmem>>, %arg12: memref<1x128xf32, #tpu.memory_space<vmem>>, %arg13: memref<128x512xbf16, #tpu.memory_space<vmem>>, %arg14: memref<1x512xf32, #tpu.memory_space<vmem>>, %arg15: memref<16x512xf32, #tpu.memory_space<vmem>>) attributes {dimension_semantics = [#tpu.dimension_semantics<arbitrary>], iteration_bounds = array<i64: 1>, scalar_prefetch = 0 : i64, scratch_operands = 0 : i64, tpu.core_type = #tpu.core_type<tc>, window_params = [{pipeline_mode = #tpu.pipeline_mode<synchronous>, transform_indices = @transform_0, window_bounds = array<i64: 144, 1200>}, {pipeline_mode = #tpu.pipeline_mode<synchronous>, transform_indices = @transform_1, window_bounds = array<i64: 1200, 128>}, {pipeline_mode = #tpu.pipeline_mode<synchronous>, transform_indices = @transform_2, window_bounds = array<i64: 1, 128>}, {pipeline_mode = #tpu.pipeline_mode<synchronous>, transform_indices = @transform_3, window_bounds = array<i64: 9, 128>}, {pipeline_mode = #tpu.pipeline_mode<synchronous>, transform_indices = @transform_4, window_bounds = array<i64: 2, 9, 10>}, {pipeline_mode = #tpu.pipeline_mode<synchronous>, transform_indices = @transform_5, window_bounds = array<i64: 10, 128>}, {pipeline_mode = #tpu.pipeline_mode<synchronous>, transform_indices = @transform_6, window_bounds = array<i64: 1, 128>}, {pipeline_mode = #tpu.pipeline_mode<synchronous>, transform_indices = @transform_7, window_bounds = array<i64: 9, 128>}, {pipeline_mode = #tpu.pipeline_mode<synchronous>, transform_indices = @transform_8, window_bounds = array<i64: 128, 128>}, {pipeline_mode = #tpu.pipeline_mode<synchronous>, transform_indices = @transform_9, window_bounds = array<i64: 1, 128>}, {pipeline_mode = #tpu.pipeline_mode<synchronous>, transform_indices = @transform_10, window_bounds = array<i64: 128, 128>}, {pipeline_mode = #tpu.pipeline_mode<synchronous>, transform_indices = @transform_11, window_bounds = array<i64: 1, 128>}, {pipeline_mode = #tpu.pipeline_mode<synchronous>, transform_indices = @transform_12, window_bounds = array<i64: 128, 512>}, {pipeline_mode = #tpu.pipeline_mode<synchronous>, transform_indices = @transform_13, window_bounds = array<i64: 1, 512>}, {pipeline_mode = #tpu.pipeline_mode<synchronous>, transform_indices = @transform_14, window_bounds = array<i64: 16, 512>}]} {
    %c0 = arith.constant 0 : index
    %c0_0 = arith.constant 0 : index
    %0 = vector.load %arg1[%c0, %c0_0] : memref<144x1200xbf16, #tpu.memory_space<vmem>>, vector<144x1200xbf16>
    %c0_1 = arith.constant 0 : index
    %c0_2 = arith.constant 0 : index
    %1 = vector.load %arg2[%c0_1, %c0_2] : memref<1200x128xbf16, #tpu.memory_space<vmem>>, vector<1200x128xbf16>
    %cst = arith.constant dense<0.000000e+00> : vector<144x128xf32>
    %2 = tpu.matmul %0, %1, %cst {dimension_numbers = #tpu.dot_dimension_numbers<[1], [0], [0], [1], [0, 0, 1, 1], [], []>} : vector<144x1200xbf16>, vector<1200x128xbf16>, vector<144x128xf32> -> vector<144x128xf32>
    %3 = vector.shape_cast %2 : vector<144x128xf32> to vector<9x16x128xf32>
    %c0_3 = arith.constant 0 : index
    %c0_4 = arith.constant 0 : index
    %4 = vector.load %arg3[%c0_3, %c0_4] : memref<1x128xf32, #tpu.memory_space<vmem>>, vector<1x128xf32>
    %5 = vector.shape_cast %4 : vector<1x128xf32> to vector<1x1x128xf32>
    %6 = vector.broadcast %5 : vector<1x1x128xf32> to vector<9x16x128xf32>
    %7 = arith.addf %3, %6 : vector<9x16x128xf32>
    %c0_5 = arith.constant 0 : index
    %c0_6 = arith.constant 0 : index
    %8 = vector.load %arg4[%c0_5, %c0_6] : memref<9x128xf32, #tpu.memory_space<vmem>>, vector<9x128xf32>
    %9 = vector.shape_cast %8 : vector<9x128xf32> to vector<9x1x128xf32>
    %10 = vector.broadcast %9 : vector<9x1x128xf32> to vector<9x16x128xf32>
    %11 = arith.addf %7, %10 : vector<9x16x128xf32>
    %cst_7 = arith.constant 0.000000e+00 : f32
    %12 = vector.broadcast %cst_7 : f32 to vector<9x16x128xf32>
    %13 = arith.maximumf %11, %12 : vector<9x16x128xf32>
    %cst_8 = arith.constant dense<0.000000e+00> : vector<16x128xf32>
    %14 = vector.multi_reduction <add>, %13, %cst_8 [0] : vector<9x16x128xf32> to vector<16x128xf32>
    %cst_9 = arith.constant 0.000000e+00 : f32
    %15 = vector.broadcast %cst_9 : f32 to vector<2x128xf32>
    %c0_10 = arith.constant 0 : index
    %c0_11 = arith.constant 0 : index
    %c0_12 = arith.constant 0 : index
    %16 = vector.load %arg5[%c0_10, %c0_11, %c0_12] : memref<2x9x10xf32, #tpu.memory_space<vmem>>, vector<2x1x10xf32>
    %17 = vector.shape_cast %16 : vector<2x1x10xf32> to vector<2x10xf32>
    %c0_13 = arith.constant 0 : index
    %c0_14 = arith.constant 0 : index
    %18 = vector.load %arg6[%c0_13, %c0_14] : memref<10x128xf32, #tpu.memory_space<vmem>>, vector<10x128xf32>
    %cst_15 = arith.constant dense<0.000000e+00> : vector<2x128xf32>
    %19 = tpu.matmul %17, %18, %cst_15 {dimension_numbers = #tpu.dot_dimension_numbers<[1], [0], [0], [1], [0, 0, 1, 1], [], []>} : vector<2x10xf32>, vector<10x128xf32>, vector<2x128xf32> -> vector<2x128xf32>
    %c0_16 = arith.constant 0 : index
    %c0_17 = arith.constant 0 : index
    %20 = vector.load %arg7[%c0_16, %c0_17] : memref<1x128xf32, #tpu.memory_space<vmem>>, vector<1x128xf32>
    %21 = vector.broadcast %20 : vector<1x128xf32> to vector<2x128xf32>
    %22 = arith.addf %19, %21 : vector<2x128xf32>
    %c0_18 = arith.constant 0 : index
    %c0_19 = arith.constant 0 : index
    %23 = vector.load %arg8[%c0_18, %c0_19] : memref<9x128xf32, #tpu.memory_space<vmem>>, vector<1x128xf32>
    %24 = vector.broadcast %23 : vector<1x128xf32> to vector<2x128xf32>
    %25 = arith.addf %22, %24 : vector<2x128xf32>
    %cst_20 = arith.constant 0.000000e+00 : f32
    %26 = vector.broadcast %cst_20 : f32 to vector<2x128xf32>
    %27 = arith.maximumf %25, %26 : vector<2x128xf32>
    %28 = arith.addf %15, %27 : vector<2x128xf32>
    %c0_21 = arith.constant 0 : index
    %c1 = arith.constant 1 : index
    %c0_22 = arith.constant 0 : index
    %29 = vector.load %arg5[%c0_21, %c1, %c0_22] : memref<2x9x10xf32, #tpu.memory_space<vmem>>, vector<2x1x10xf32>
    %30 = vector.shape_cast %29 : vector<2x1x10xf32> to vector<2x10xf32>
    %c0_23 = arith.constant 0 : index
    %c0_24 = arith.constant 0 : index
    %31 = vector.load %arg6[%c0_23, %c0_24] : memref<10x128xf32, #tpu.memory_space<vmem>>, vector<10x128xf32>
    %cst_25 = arith.constant dense<0.000000e+00> : vector<2x128xf32>
    %32 = tpu.matmul %30, %31, %cst_25 {dimension_numbers = #tpu.dot_dimension_numbers<[1], [0], [0], [1], [0, 0, 1, 1], [], []>} : vector<2x10xf32>, vector<10x128xf32>, vector<2x128xf32> -> vector<2x128xf32>
    %c0_26 = arith.constant 0 : index
    %c0_27 = arith.constant 0 : index
    %33 = vector.load %arg7[%c0_26, %c0_27] : memref<1x128xf32, #tpu.memory_space<vmem>>, vector<1x128xf32>
    %34 = vector.broadcast %33 : vector<1x128xf32> to vector<2x128xf32>
    %35 = arith.addf %32, %34 : vector<2x128xf32>
    %c1_28 = arith.constant 1 : index
    %c0_29 = arith.constant 0 : index
    %36 = vector.load %arg8[%c1_28, %c0_29] : memref<9x128xf32, #tpu.memory_space<vmem>>, vector<1x128xf32>
    %37 = vector.broadcast %36 : vector<1x128xf32> to vector<2x128xf32>
    %38 = arith.addf %35, %37 : vector<2x128xf32>
    %cst_30 = arith.constant 0.000000e+00 : f32
    %39 = vector.broadcast %cst_30 : f32 to vector<2x128xf32>
    %40 = arith.maximumf %38, %39 : vector<2x128xf32>
    %41 = arith.addf %28, %40 : vector<2x128xf32>
    %c0_31 = arith.constant 0 : index
    %c2 = arith.constant 2 : index
    %c0_32 = arith.constant 0 : index
    %42 = vector.load %arg5[%c0_31, %c2, %c0_32] : memref<2x9x10xf32, #tpu.memory_space<vmem>>, vector<2x1x10xf32>
    %43 = vector.shape_cast %42 : vector<2x1x10xf32> to vector<2x10xf32>
    %c0_33 = arith.constant 0 : index
    %c0_34 = arith.constant 0 : index
    %44 = vector.load %arg6[%c0_33, %c0_34] : memref<10x128xf32, #tpu.memory_space<vmem>>, vector<10x128xf32>
    %cst_35 = arith.constant dense<0.000000e+00> : vector<2x128xf32>
    %45 = tpu.matmul %43, %44, %cst_35 {dimension_numbers = #tpu.dot_dimension_numbers<[1], [0], [0], [1], [0, 0, 1, 1], [], []>} : vector<2x10xf32>, vector<10x128xf32>, vector<2x128xf32> -> vector<2x128xf32>
    %c0_36 = arith.constant 0 : index
    %c0_37 = arith.constant 0 : index
    %46 = vector.load %arg7[%c0_36, %c0_37] : memref<1x128xf32, #tpu.memory_space<vmem>>, vector<1x128xf32>
    %47 = vector.broadcast %46 : vector<1x128xf32> to vector<2x128xf32>
    %48 = arith.addf %45, %47 : vector<2x128xf32>
    %c2_38 = arith.constant 2 : index
    %c0_39 = arith.constant 0 : index
    %49 = vector.load %arg8[%c2_38, %c0_39] : memref<9x128xf32, #tpu.memory_space<vmem>>, vector<1x128xf32>
    %50 = vector.broadcast %49 : vector<1x128xf32> to vector<2x128xf32>
    %51 = arith.addf %48, %50 : vector<2x128xf32>
    %cst_40 = arith.constant 0.000000e+00 : f32
    %52 = vector.broadcast %cst_40 : f32 to vector<2x128xf32>
    %53 = arith.maximumf %51, %52 : vector<2x128xf32>
    %54 = arith.addf %41, %53 : vector<2x128xf32>
    %c0_41 = arith.constant 0 : index
    %c3 = arith.constant 3 : index
    %c0_42 = arith.constant 0 : index
    %55 = vector.load %arg5[%c0_41, %c3, %c0_42] : memref<2x9x10xf32, #tpu.memory_space<vmem>>, vector<2x1x10xf32>
    %56 = vector.shape_cast %55 : vector<2x1x10xf32> to vector<2x10xf32>
    %c0_43 = arith.constant 0 : index
    %c0_44 = arith.constant 0 : index
    %57 = vector.load %arg6[%c0_43, %c0_44] : memref<10x128xf32, #tpu.memory_space<vmem>>, vector<10x128xf32>
    %cst_45 = arith.constant dense<0.000000e+00> : vector<2x128xf32>
    %58 = tpu.matmul %56, %57, %cst_45 {dimension_numbers = #tpu.dot_dimension_numbers<[1], [0], [0], [1], [0, 0, 1, 1], [], []>} : vector<2x10xf32>, vector<10x128xf32>, vector<2x128xf32> -> vector<2x128xf32>
    %c0_46 = arith.constant 0 : index
    %c0_47 = arith.constant 0 : index
    %59 = vector.load %arg7[%c0_46, %c0_47] : memref<1x128xf32, #tpu.memory_space<vmem>>, vector<1x128xf32>
    %60 = vector.broadcast %59 : vector<1x128xf32> to vector<2x128xf32>
    %61 = arith.addf %58, %60 : vector<2x128xf32>
    %c3_48 = arith.constant 3 : index
    %c0_49 = arith.constant 0 : index
    %62 = vector.load %arg8[%c3_48, %c0_49] : memref<9x128xf32, #tpu.memory_space<vmem>>, vector<1x128xf32>
    %63 = vector.broadcast %62 : vector<1x128xf32> to vector<2x128xf32>
    %64 = arith.addf %61, %63 : vector<2x128xf32>
    %cst_50 = arith.constant 0.000000e+00 : f32
    %65 = vector.broadcast %cst_50 : f32 to vector<2x128xf32>
    %66 = arith.maximumf %64, %65 : vector<2x128xf32>
    %67 = arith.addf %54, %66 : vector<2x128xf32>
    %c0_51 = arith.constant 0 : index
    %c4 = arith.constant 4 : index
    %c0_52 = arith.constant 0 : index
    %68 = vector.load %arg5[%c0_51, %c4, %c0_52] : memref<2x9x10xf32, #tpu.memory_space<vmem>>, vector<2x1x10xf32>
    %69 = vector.shape_cast %68 : vector<2x1x10xf32> to vector<2x10xf32>
    %c0_53 = arith.constant 0 : index
    %c0_54 = arith.constant 0 : index
    %70 = vector.load %arg6[%c0_53, %c0_54] : memref<10x128xf32, #tpu.memory_space<vmem>>, vector<10x128xf32>
    %cst_55 = arith.constant dense<0.000000e+00> : vector<2x128xf32>
    %71 = tpu.matmul %69, %70, %cst_55 {dimension_numbers = #tpu.dot_dimension_numbers<[1], [0], [0], [1], [0, 0, 1, 1], [], []>} : vector<2x10xf32>, vector<10x128xf32>, vector<2x128xf32> -> vector<2x128xf32>
    %c0_56 = arith.constant 0 : index
    %c0_57 = arith.constant 0 : index
    %72 = vector.load %arg7[%c0_56, %c0_57] : memref<1x128xf32, #tpu.memory_space<vmem>>, vector<1x128xf32>
    %73 = vector.broadcast %72 : vector<1x128xf32> to vector<2x128xf32>
    %74 = arith.addf %71, %73 : vector<2x128xf32>
    %c4_58 = arith.constant 4 : index
    %c0_59 = arith.constant 0 : index
    %75 = vector.load %arg8[%c4_58, %c0_59] : memref<9x128xf32, #tpu.memory_space<vmem>>, vector<1x128xf32>
    %76 = vector.broadcast %75 : vector<1x128xf32> to vector<2x128xf32>
    %77 = arith.addf %74, %76 : vector<2x128xf32>
    %cst_60 = arith.constant 0.000000e+00 : f32
    %78 = vector.broadcast %cst_60 : f32 to vector<2x128xf32>
    %79 = arith.maximumf %77, %78 : vector<2x128xf32>
    %80 = arith.addf %67, %79 : vector<2x128xf32>
    %c0_61 = arith.constant 0 : index
    %c5 = arith.constant 5 : index
    %c0_62 = arith.constant 0 : index
    %81 = vector.load %arg5[%c0_61, %c5, %c0_62] : memref<2x9x10xf32, #tpu.memory_space<vmem>>, vector<2x1x10xf32>
    %82 = vector.shape_cast %81 : vector<2x1x10xf32> to vector<2x10xf32>
    %c0_63 = arith.constant 0 : index
    %c0_64 = arith.constant 0 : index
    %83 = vector.load %arg6[%c0_63, %c0_64] : memref<10x128xf32, #tpu.memory_space<vmem>>, vector<10x128xf32>
    %cst_65 = arith.constant dense<0.000000e+00> : vector<2x128xf32>
    %84 = tpu.matmul %82, %83, %cst_65 {dimension_numbers = #tpu.dot_dimension_numbers<[1], [0], [0], [1], [0, 0, 1, 1], [], []>} : vector<2x10xf32>, vector<10x128xf32>, vector<2x128xf32> -> vector<2x128xf32>
    %c0_66 = arith.constant 0 : index
    %c0_67 = arith.constant 0 : index
    %85 = vector.load %arg7[%c0_66, %c0_67] : memref<1x128xf32, #tpu.memory_space<vmem>>, vector<1x128xf32>
    %86 = vector.broadcast %85 : vector<1x128xf32> to vector<2x128xf32>
    %87 = arith.addf %84, %86 : vector<2x128xf32>
    %c5_68 = arith.constant 5 : index
    %c0_69 = arith.constant 0 : index
    %88 = vector.load %arg8[%c5_68, %c0_69] : memref<9x128xf32, #tpu.memory_space<vmem>>, vector<1x128xf32>
    %89 = vector.broadcast %88 : vector<1x128xf32> to vector<2x128xf32>
    %90 = arith.addf %87, %89 : vector<2x128xf32>
    %cst_70 = arith.constant 0.000000e+00 : f32
    %91 = vector.broadcast %cst_70 : f32 to vector<2x128xf32>
    %92 = arith.maximumf %90, %91 : vector<2x128xf32>
    %93 = arith.addf %80, %92 : vector<2x128xf32>
    %c0_71 = arith.constant 0 : index
    %c6 = arith.constant 6 : index
    %c0_72 = arith.constant 0 : index
    %94 = vector.load %arg5[%c0_71, %c6, %c0_72] : memref<2x9x10xf32, #tpu.memory_space<vmem>>, vector<2x1x10xf32>
    %95 = vector.shape_cast %94 : vector<2x1x10xf32> to vector<2x10xf32>
    %c0_73 = arith.constant 0 : index
    %c0_74 = arith.constant 0 : index
    %96 = vector.load %arg6[%c0_73, %c0_74] : memref<10x128xf32, #tpu.memory_space<vmem>>, vector<10x128xf32>
    %cst_75 = arith.constant dense<0.000000e+00> : vector<2x128xf32>
    %97 = tpu.matmul %95, %96, %cst_75 {dimension_numbers = #tpu.dot_dimension_numbers<[1], [0], [0], [1], [0, 0, 1, 1], [], []>} : vector<2x10xf32>, vector<10x128xf32>, vector<2x128xf32> -> vector<2x128xf32>
    %c0_76 = arith.constant 0 : index
    %c0_77 = arith.constant 0 : index
    %98 = vector.load %arg7[%c0_76, %c0_77] : memref<1x128xf32, #tpu.memory_space<vmem>>, vector<1x128xf32>
    %99 = vector.broadcast %98 : vector<1x128xf32> to vector<2x128xf32>
    %100 = arith.addf %97, %99 : vector<2x128xf32>
    %c6_78 = arith.constant 6 : index
    %c0_79 = arith.constant 0 : index
    %101 = vector.load %arg8[%c6_78, %c0_79] : memref<9x128xf32, #tpu.memory_space<vmem>>, vector<1x128xf32>
    %102 = vector.broadcast %101 : vector<1x128xf32> to vector<2x128xf32>
    %103 = arith.addf %100, %102 : vector<2x128xf32>
    %cst_80 = arith.constant 0.000000e+00 : f32
    %104 = vector.broadcast %cst_80 : f32 to vector<2x128xf32>
    %105 = arith.maximumf %103, %104 : vector<2x128xf32>
    %106 = arith.addf %93, %105 : vector<2x128xf32>
    %c0_81 = arith.constant 0 : index
    %c7 = arith.constant 7 : index
    %c0_82 = arith.constant 0 : index
    %107 = vector.load %arg5[%c0_81, %c7, %c0_82] : memref<2x9x10xf32, #tpu.memory_space<vmem>>, vector<2x1x10xf32>
    %108 = vector.shape_cast %107 : vector<2x1x10xf32> to vector<2x10xf32>
    %c0_83 = arith.constant 0 : index
    %c0_84 = arith.constant 0 : index
    %109 = vector.load %arg6[%c0_83, %c0_84] : memref<10x128xf32, #tpu.memory_space<vmem>>, vector<10x128xf32>
    %cst_85 = arith.constant dense<0.000000e+00> : vector<2x128xf32>
    %110 = tpu.matmul %108, %109, %cst_85 {dimension_numbers = #tpu.dot_dimension_numbers<[1], [0], [0], [1], [0, 0, 1, 1], [], []>} : vector<2x10xf32>, vector<10x128xf32>, vector<2x128xf32> -> vector<2x128xf32>
    %c0_86 = arith.constant 0 : index
    %c0_87 = arith.constant 0 : index
    %111 = vector.load %arg7[%c0_86, %c0_87] : memref<1x128xf32, #tpu.memory_space<vmem>>, vector<1x128xf32>
    %112 = vector.broadcast %111 : vector<1x128xf32> to vector<2x128xf32>
    %113 = arith.addf %110, %112 : vector<2x128xf32>
    %c7_88 = arith.constant 7 : index
    %c0_89 = arith.constant 0 : index
    %114 = vector.load %arg8[%c7_88, %c0_89] : memref<9x128xf32, #tpu.memory_space<vmem>>, vector<1x128xf32>
    %115 = vector.broadcast %114 : vector<1x128xf32> to vector<2x128xf32>
    %116 = arith.addf %113, %115 : vector<2x128xf32>
    %cst_90 = arith.constant 0.000000e+00 : f32
    %117 = vector.broadcast %cst_90 : f32 to vector<2x128xf32>
    %118 = arith.maximumf %116, %117 : vector<2x128xf32>
    %119 = arith.addf %106, %118 : vector<2x128xf32>
    %c0_91 = arith.constant 0 : index
    %c8 = arith.constant 8 : index
    %c0_92 = arith.constant 0 : index
    %120 = vector.load %arg5[%c0_91, %c8, %c0_92] : memref<2x9x10xf32, #tpu.memory_space<vmem>>, vector<2x1x10xf32>
    %121 = vector.shape_cast %120 : vector<2x1x10xf32> to vector<2x10xf32>
    %c0_93 = arith.constant 0 : index
    %c0_94 = arith.constant 0 : index
    %122 = vector.load %arg6[%c0_93, %c0_94] : memref<10x128xf32, #tpu.memory_space<vmem>>, vector<10x128xf32>
    %cst_95 = arith.constant dense<0.000000e+00> : vector<2x128xf32>
    %123 = tpu.matmul %121, %122, %cst_95 {dimension_numbers = #tpu.dot_dimension_numbers<[1], [0], [0], [1], [0, 0, 1, 1], [], []>} : vector<2x10xf32>, vector<10x128xf32>, vector<2x128xf32> -> vector<2x128xf32>
    %c0_96 = arith.constant 0 : index
    %c0_97 = arith.constant 0 : index
    %124 = vector.load %arg7[%c0_96, %c0_97] : memref<1x128xf32, #tpu.memory_space<vmem>>, vector<1x128xf32>
    %125 = vector.broadcast %124 : vector<1x128xf32> to vector<2x128xf32>
    %126 = arith.addf %123, %125 : vector<2x128xf32>
    %c8_98 = arith.constant 8 : index
    %c0_99 = arith.constant 0 : index
    %127 = vector.load %arg8[%c8_98, %c0_99] : memref<9x128xf32, #tpu.memory_space<vmem>>, vector<1x128xf32>
    %128 = vector.broadcast %127 : vector<1x128xf32> to vector<2x128xf32>
    %129 = arith.addf %126, %128 : vector<2x128xf32>
    %cst_100 = arith.constant 0.000000e+00 : f32
    %130 = vector.broadcast %cst_100 : f32 to vector<2x128xf32>
    %131 = arith.maximumf %129, %130 : vector<2x128xf32>
    %132 = arith.addf %119, %131 : vector<2x128xf32>
    %133 = arith.truncf %14 : vector<16x128xf32> to vector<16x128xbf16>
    %c0_101 = arith.constant 0 : index
    %c0_102 = arith.constant 0 : index
    %134 = vector.load %arg9[%c0_101, %c0_102] : memref<128x128xbf16, #tpu.memory_space<vmem>>, vector<128x128xbf16>
    %cst_103 = arith.constant dense<0.000000e+00> : vector<16x128xf32>
    %135 = tpu.matmul %133, %134, %cst_103 {dimension_numbers = #tpu.dot_dimension_numbers<[1], [0], [0], [1], [0, 0, 1, 1], [], []>} : vector<16x128xbf16>, vector<128x128xbf16>, vector<16x128xf32> -> vector<16x128xf32>
    %c0_104 = arith.constant 0 : index
    %c0_105 = arith.constant 0 : index
    %136 = vector.load %arg10[%c0_104, %c0_105] : memref<1x128xf32, #tpu.memory_space<vmem>>, vector<1x128xf32>
    %137 = vector.broadcast %136 : vector<1x128xf32> to vector<16x128xf32>
    %138 = arith.addf %135, %137 : vector<16x128xf32>
    %cst_106 = arith.constant 0.000000e+00 : f32
    %139 = vector.broadcast %cst_106 : f32 to vector<16x128xf32>
    %140 = arith.maximumf %138, %139 : vector<16x128xf32>
    %141 = vector.shape_cast %140 : vector<16x128xf32> to vector<2x8x128xf32>
    %142 = vector.shape_cast %132 : vector<2x128xf32> to vector<2x1x128xf32>
    %143 = vector.broadcast %142 : vector<2x1x128xf32> to vector<2x8x128xf32>
    %144 = arith.mulf %141, %143 : vector<2x8x128xf32>
    %145 = arith.addf %144, %141 : vector<2x8x128xf32>
    %146 = vector.shape_cast %145 : vector<2x8x128xf32> to vector<16x128xf32>
    %147 = arith.truncf %146 : vector<16x128xf32> to vector<16x128xbf16>
    %c0_107 = arith.constant 0 : index
    %c0_108 = arith.constant 0 : index
    %148 = vector.load %arg11[%c0_107, %c0_108] : memref<128x128xbf16, #tpu.memory_space<vmem>>, vector<128x128xbf16>
    %cst_109 = arith.constant dense<0.000000e+00> : vector<16x128xf32>
    %149 = tpu.matmul %147, %148, %cst_109 {dimension_numbers = #tpu.dot_dimension_numbers<[1], [0], [0], [1], [0, 0, 1, 1], [], []>} : vector<16x128xbf16>, vector<128x128xbf16>, vector<16x128xf32> -> vector<16x128xf32>
    %c0_110 = arith.constant 0 : index
    %c0_111 = arith.constant 0 : index
    %150 = vector.load %arg12[%c0_110, %c0_111] : memref<1x128xf32, #tpu.memory_space<vmem>>, vector<1x128xf32>
    %151 = vector.broadcast %150 : vector<1x128xf32> to vector<16x128xf32>
    %152 = arith.addf %149, %151 : vector<16x128xf32>
    %cst_112 = arith.constant 0.000000e+00 : f32
    %153 = vector.broadcast %cst_112 : f32 to vector<16x128xf32>
    %154 = arith.maximumf %152, %153 : vector<16x128xf32>
    %155 = arith.truncf %154 : vector<16x128xf32> to vector<16x128xbf16>
    %c0_113 = arith.constant 0 : index
    %c0_114 = arith.constant 0 : index
    %156 = vector.load %arg13[%c0_113, %c0_114] : memref<128x512xbf16, #tpu.memory_space<vmem>>, vector<128x512xbf16>
    %cst_115 = arith.constant dense<0.000000e+00> : vector<16x512xf32>
    %157 = tpu.matmul %155, %156, %cst_115 {dimension_numbers = #tpu.dot_dimension_numbers<[1], [0], [0], [1], [0, 0, 1, 1], [], []>} : vector<16x128xbf16>, vector<128x512xbf16>, vector<16x512xf32> -> vector<16x512xf32>
    %c0_116 = arith.constant 0 : index
    %c0_117 = arith.constant 0 : index
    %158 = vector.load %arg14[%c0_116, %c0_117] : memref<1x512xf32, #tpu.memory_space<vmem>>, vector<1x512xf32>
    %159 = vector.broadcast %158 : vector<1x512xf32> to vector<16x512xf32>
    %160 = arith.addf %157, %159 : vector<16x512xf32>
    %c0_118 = arith.constant 0 : index
    %c0_119 = arith.constant 0 : index
    %161 = vector.load %arg15[%c0_118, %c0_119] : memref<16x512xf32, #tpu.memory_space<vmem>>, vector<16x512xf32>
    tpu.vector_store %arg15[%c0_118, %c0_119], %160 {strides = array<i32>} : memref<16x512xf32, #tpu.memory_space<vmem>>, vector<16x512xf32>,
    return
  }
  func.func @transform_0(%arg0: i32) -> (i32, i32) {
    %c0_i32 = arith.constant 0 : i32
    %c0_i32_0 = arith.constant 0 : i32
    %c0_i32_1 = arith.constant 0 : i32
    return %c0_i32, %c0_i32_0 : i32, i32
  }
  func.func @transform_1(%arg0: i32) -> (i32, i32) {
    %c0_i32 = arith.constant 0 : i32
    %c0_i32_0 = arith.constant 0 : i32
    %c0_i32_1 = arith.constant 0 : i32
    return %c0_i32, %c0_i32_0 : i32, i32
  }
  func.func @transform_2(%arg0: i32) -> (i32, i32) {
    %c0_i32 = arith.constant 0 : i32
    %c0_i32_0 = arith.constant 0 : i32
    %c0_i32_1 = arith.constant 0 : i32
    return %c0_i32, %c0_i32_0 : i32, i32
  }
  func.func @transform_3(%arg0: i32) -> (i32, i32) {
    %c0_i32 = arith.constant 0 : i32
    %c0_i32_0 = arith.constant 0 : i32
    %c0_i32_1 = arith.constant 0 : i32
    return %c0_i32, %c0_i32_0 : i32, i32
  }
  func.func @transform_4(%arg0: i32) -> (i32, i32, i32) {
    %c0_i32 = arith.constant 0 : i32
    %c0_i32_0 = arith.constant 0 : i32
    %c0_i32_1 = arith.constant 0 : i32
    %c0_i32_2 = arith.constant 0 : i32
    return %c0_i32, %c0_i32_0, %c0_i32_1 : i32, i32, i32
  }
  func.func @transform_5(%arg0: i32) -> (i32, i32) {
    %c0_i32 = arith.constant 0 : i32
    %c0_i32_0 = arith.constant 0 : i32
    %c0_i32_1 = arith.constant 0 : i32
    return %c0_i32, %c0_i32_0 : i32, i32
  }
  func.func @transform_6(%arg0: i32) -> (i32, i32) {
    %c0_i32 = arith.constant 0 : i32
    %c0_i32_0 = arith.constant 0 : i32
    %c0_i32_1 = arith.constant 0 : i32
    return %c0_i32, %c0_i32_0 : i32, i32
  }
  func.func @transform_7(%arg0: i32) -> (i32, i32) {
    %c0_i32 = arith.constant 0 : i32
    %c0_i32_0 = arith.constant 0 : i32
    %c0_i32_1 = arith.constant 0 : i32
    return %c0_i32, %c0_i32_0 : i32, i32
  }
  func.func @transform_8(%arg0: i32) -> (i32, i32) {
    %c0_i32 = arith.constant 0 : i32
    %c0_i32_0 = arith.constant 0 : i32
    %c0_i32_1 = arith.constant 0 : i32
    return %c0_i32, %c0_i32_0 : i32, i32
  }
  func.func @transform_9(%arg0: i32) -> (i32, i32) {
    %c0_i32 = arith.constant 0 : i32
    %c0_i32_0 = arith.constant 0 : i32
    %c0_i32_1 = arith.constant 0 : i32
    return %c0_i32, %c0_i32_0 : i32, i32
  }
  func.func @transform_10(%arg0: i32) -> (i32, i32) {
    %c0_i32 = arith.constant 0 : i32
    %c0_i32_0 = arith.constant 0 : i32
    %c0_i32_1 = arith.constant 0 : i32
    return %c0_i32, %c0_i32_0 : i32, i32
  }
  func.func @transform_11(%arg0: i32) -> (i32, i32) {
    %c0_i32 = arith.constant 0 : i32
    %c0_i32_0 = arith.constant 0 : i32
    %c0_i32_1 = arith.constant 0 : i32
    return %c0_i32, %c0_i32_0 : i32, i32
  }
  func.func @transform_12(%arg0: i32) -> (i32, i32) {
    %c0_i32 = arith.constant 0 : i32
    %c0_i32_0 = arith.constant 0 : i32
    %c0_i32_1 = arith.constant 0 : i32
    return %c0_i32, %c0_i32_0 : i32, i32
  }
  func.func @transform_13(%arg0: i32) -> (i32, i32) {
    %c0_i32 = arith.constant 0 : i32
    %c0_i32_0 = arith.constant 0 : i32
    %c0_i32_1 = arith.constant 0 : i32
    return %c0_i32, %c0_i32_0 : i32, i32
  }
  func.func @transform_14(%arg0: i32) -> (i32, i32) {
    %c0_i32 = arith.constant 0 : i32
    %c0_i32_0 = arith.constant 0 : i32
    %c0_i32_1 = arith.constant 0 : i32
    return %c0_i32, %c0_i32_0 : i32, i32
  }
}

</mosaic_0001>

<bundles_post_ra>
// kernel: tpu_custom_call.1
= control target key start
LH: loop header
LB: loop body
LE: loop exit
PB: predicated region body
PF: predicated region fallthrough
CT: control target
= control target key end

     0   :  { %19 = vsyncpa [#allocation3], 0  ;;  %s5285_s0 = inlined_call_operand.hbm [shape: bf16[144,1200], index: 0, kind: input, shape index: {}]   ;;  %s5286_s1 = inlined_call_operand.hbm [shape: bf16[1200,128], index: 1, kind: input, shape index: {}]   ;;  %s5287_s2 = inlined_call_operand.hbm [shape: f32[1,128], index: 2, kind: input, shape index: {}]   ;;  %s5288_s3 = inlined_call_operand.vmem [shape: f32[9,128], index: 3, kind: input, shape index: {}]   ;;  %s5289_s4 = inlined_call_operand.vmem [shape: f32[2,9,10], index: 4, kind: input, shape index: {}]   ;;  %s5290_s5 = inlined_call_operand.hbm [shape: f32[10,128], index: 5, kind: input, shape index: {}]   ;;  %s5291_s6 = inlined_call_operand.hbm [shape: f32[1,128], index: 6, kind: input, shape index: {}]   ;;  %s5292_s7 = inlined_call_operand.hbm [shape: f32[9,128], index: 7, kind: input, shape index: {}]   ;;  %s5293_s8 = inlined_call_operand.vmem [shape: bf16[128,128], index: 8, kind: input, shape index: {}]   ;;  %s5294_s9 = inlined_call_operand.hbm [shape: f32[1,128], index: 9, kind: input, shape index: {}]   ;;  %s5295_s10 = inlined_call_operand.hbm [shape: bf16[128,128], index: 10, kind: input, shape index: {}]   ;;  %s5296_s11 = inlined_call_operand.vmem [shape: f32[1,128], index: 11, kind: input, shape index: {}]   ;;  %s5297_s12 = inlined_call_operand.hbm [shape: bf16[128,512], index: 12, kind: input, shape index: {}]   ;;  %s5298_s13 = inlined_call_operand.vmem [shape: f32[1,512], index: 13, kind: input, shape index: {}]   ;;  %s5299_s14 = inlined_call_operand.hbm [shape: f32[16,512], index: 14, kind: output, shape index: {}]  }
   0x1   :  { %20 = vsyncpa [#allocation6], 0 }
   0x2   :  { %21 = vsyncpa [#allocation9], 0 }
   0x3   :  { %22 = vsyncpa [#allocation12], 0 }
   0x4   :  { %23 = vsyncpa [#allocation15], 0 }
   0x5   :  { %24 = vsyncpa [#allocation4], 0  ;;  %s4675_s29 = smov [#allocation5]   ;;  %s4443_s17 = scalar_lea.hbm %s5286_s1, 9600 }
   0x6   :  { %s42_s30 = sshll.u32 %s4675_s29, 4  ;;  %p4444_p0 = scmp.ne.s32.totalorder %s5286_s1, %s4443_s17  ;;  %s43_s30 = int_to_ptr.vmem [resolvable:$true] %s42_s30 }
   0x7   :  { %p4447_p1 = scmp.lt.u32.totalorder %s4443_s17, %s5286_s1 }
   0x9   :  { %p4449_p2 = pnand %p4447_p1, %p4444_p0 }
   0xb   :  { %4452 = shalt.err (!%p4449_p2)
}
   0xc   :  { %s4453_s22 = scalar_lea.vmem %s43_s30, 9600  ;;  %p4458_p4 = scmp.lt.s32.totalorder %s43_s30, %s43_s30 }
   0xd   :  { %p4454_p3 = scmp.ne.s32.totalorder %s43_s30, %s4453_s22  ;;  %p4459_p5 = scmp.lt.s32.totalorder %s4453_s22, %s4453_s22 }
   0xf   :  { %p4460_p6 = por %p4459_p5, %p4458_p4 }
  0x11   :  { %p4461_p7 = pnand %p4460_p6, %p4454_p3 }
  0x13   :  { %4464 = shalt.err (!%p4461_p7)
}
  0x14   :  { %s5300_s23 = smov 64   ;;  %s4677_s24 = smov 4  }
  0x15   :  { %48 = dma.hbm_to_vmem [thread:$0]  %s5286_s1, 9600, %s43_s30, [#allocation6], %s5300_s23, %s5300_s23, %s4677_s24  }
  0x16   :  { %s4678_s27 = smov [#allocation8]   ;;  %s4465_s16 = scalar_lea.hbm %s5290_s5, 256 }
  0x17   :  { %s68_s28 = sshll.u32 %s4678_s27, 4  ;;  %p4466_p8 = scmp.ne.s32.totalorder %s5290_s5, %s4465_s16  ;;  %s69_s28 = int_to_ptr.vmem [resolvable:$true] %s68_s28 }
  0x18   :  { %p4469_p9 = scmp.lt.u32.totalorder %s4465_s16, %s5290_s5 }
  0x1a   :  { %p4471_p10 = pnand %p4469_p9, %p4466_p8 }
  0x1c   :  { %4474 = shalt.err (!%p4471_p10)
}
  0x1d   :  { %s4475_s21 = scalar_lea.vmem %s69_s28, 256  ;;  %p4480_p12 = scmp.lt.s32.totalorder %s69_s28, %s69_s28 }
  0x1e   :  { %p4476_p11 = scmp.ne.s32.totalorder %s69_s28, %s4475_s21  ;;  %p4481_p13 = scmp.lt.s32.totalorder %s4475_s21, %s4475_s21 }
  0x20   :  { %p4482_p0 = por %p4481_p13, %p4480_p12 }
  0x22   :  { %p4483_p1 = pnand %p4482_p0, %p4476_p11 }
  0x24   :  { %4486 = shalt.err (!%p4483_p1)
}
  0x25   :  { %s4679_s1 = smov 128   ;;  %s4680_s30 = smov 8  }
  0x26   :  { %74 = dma.hbm_to_vmem [thread:$0]  %s5290_s5, 256, %s69_s28, [#allocation9], %s4679_s1, %s4679_s1, %s4680_s30  }
  0x27   :  { %s4681_s26 = smov [#allocation11]   ;;  %s4682_s29 = smov [#allocation14]  }
  0x28   :  { %s90_s27 = sshll.u32 %s4681_s26, 4  ;;  %s114_s15 = sshll.u32 %s4682_s29, 4  ;;  %s91_s27 = int_to_ptr.vmem [resolvable:$true] %s90_s27  ;;  %s4803_s15 = int_to_ptr.vmem [resolvable:$true] %s114_s15 }
  0x29   :  { %s4487_s18 = scalar_lea.hbm %s5292_s7, 256 }
  0x2a   :  { %p4488_p2 = scmp.ne.s32.totalorder %s5292_s7, %s4487_s18  ;;  %p4491_p3 = scmp.lt.u32.totalorder %s4487_s18, %s5292_s7 }
  0x2c   :  { %p4493_p4 = pnand %p4491_p3, %p4488_p2 }
  0x2e   :  { %4496 = shalt.err (!%p4493_p4)
}
  0x2f   :  { %s4497_s5 = scalar_lea.vmem %s91_s27, 256  ;;  %p4502_p6 = scmp.lt.s32.totalorder %s91_s27, %s91_s27 }
  0x30   :  { %p4498_p5 = scmp.ne.s32.totalorder %s91_s27, %s4497_s5  ;;  %p4503_p7 = scmp.lt.s32.totalorder %s4497_s5, %s4497_s5 }
  0x32   :  { %p4504_p8 = por %p4503_p7, %p4502_p6 }
  0x34   :  { %p4505_p9 = pnand %p4504_p8, %p4498_p5 }
  0x36   :  { %4508 = shalt.err (!%p4505_p9)
}
  0x37   :  { %96 = dma.hbm_to_vmem [thread:$0]  %s5292_s7, 256, %s91_s27, [#allocation12], %s4679_s1, %s4679_s1, %s4680_s30  }
  0x38   :  { %s4509_s29 = scalar_lea.hbm %s5295_s10, 1024 }
  0x39   :  { %p4510_p10 = scmp.ne.s32.totalorder %s5295_s10, %s4509_s29  ;;  %p4513_p11 = scmp.lt.u32.totalorder %s4509_s29, %s5295_s10 }
  0x3b   :  { %p4515_p12 = pnand %p4513_p11, %p4510_p10 }
  0x3d   :  { %4518 = shalt.err (!%p4515_p12)
}
  0x3e   :  { %s4519_s19 = scalar_lea.vmem %s4803_s15, 1024  ;;  %p4524_p0 = scmp.lt.s32.totalorder %s4803_s15, %s4803_s15 }
  0x3f   :  { %p4520_p13 = scmp.ne.s32.totalorder %s4803_s15, %s4519_s19  ;;  %p4525_p1 = scmp.lt.s32.totalorder %s4519_s19, %s4519_s19 }
  0x41   :  { %p4526_p2 = por %p4525_p1, %p4524_p0 }
  0x43   :  { %p4527_p3 = pnand %p4526_p2, %p4520_p13 }
  0x45   :  { %4530 = shalt.err (!%p4527_p3)
}
  0x46   :  { %s5301_s7 = smov 64   ;;  %s4683_s27 = smov [#allocation2]  }
  0x47   :  { %120 = dma.hbm_to_vmem [thread:$0]  %s5295_s10, 1024, %s4803_s15, [#allocation15], %s5301_s7, %s5301_s7, %s4677_s24  }
  0x48   :  { %s30_s20 = sshll.u32 %s4683_s27, 4  ;;  %s4531_s28 = scalar_lea.hbm %s5285_s0, 11520  ;;  %s31_s20 = int_to_ptr.vmem [resolvable:$true] %s30_s20 }
  0x49   :  { %p4532_p4 = scmp.ne.s32.totalorder %s5285_s0, %s4531_s28  ;;  %p4535_p5 = scmp.lt.u32.totalorder %s4531_s28, %s5285_s0 }
  0x4b   :  { %p4537_p6 = pnand %p4535_p5, %p4532_p4 }
  0x4d   :  { %4540 = shalt.err (!%p4537_p6)
}
  0x4e   :  { %s4541_s16 = scalar_lea.vmem %s31_s20, 11520  ;;  %p4546_p8 = scmp.lt.s32.totalorder %s31_s20, %s31_s20 }
  0x4f   :  { %p4542_p7 = scmp.ne.s32.totalorder %s31_s20, %s4541_s16  ;;  %p4547_p9 = scmp.lt.s32.totalorder %s4541_s16, %s4541_s16 }
  0x51   :  { %p4548_p10 = por %p4547_p9, %p4546_p8 }
  0x53   :  { %p4549_p11 = pnand %p4548_p10, %p4542_p7 }
  0x55   :  { %4552 = shalt.err (!%p4549_p11)
}
  0x56   :  { %s4684_s10 = smov 640   ;;  %s4685_s24 = smov 40  }
  0x57   :  { %36 = dma.hbm_to_vmem [thread:$0]  %s5285_s0, 11520, %s31_s20, [#allocation3], %s4684_s10, %s4684_s10, %s4685_s24  }
  0x58   :  { %s4686_s17 = smov [#allocation7]   ;;  %s4687_s19 = smov [#allocation10]  }
  0x59   :  { %s55_s18 = sshll.u32 %s4686_s17, 4  ;;  %s81_s7 = sshll.u32 %s4687_s19, 4  ;;  %s56_s18 = int_to_ptr.vmem [resolvable:$true] %s55_s18  ;;  %s82_s7 = int_to_ptr.vmem [resolvable:$true] %s81_s7 }
  0x5a   :  { %s4553_s27 = scalar_lea.hbm %s5287_s2, 16 }
  0x5b   :  { %p4554_p12 = scmp.ne.s32.totalorder %s5287_s2, %s4553_s27  ;;  %p4557_p13 = scmp.lt.u32.totalorder %s4553_s27, %s5287_s2 }
  0x5d   :  { %p4559_p0 = pnand %p4557_p13, %p4554_p12 }
  0x5f   :  { %4562 = shalt.err (!%p4559_p0)
}
  0x60   :  { %s4563_s0 = scalar_lea.vmem %s56_s18, 16  ;;  %s4567_s20 = scalar_lea.vmem %s56_s18, 32 }
  0x61   :  { %p4564_p1 = scmp.ne.s32.totalorder %s56_s18, %s4563_s0  ;;  %p4568_p2 = scmp.lt.s32.totalorder %s56_s18, %s56_s18 }
  0x62   :  { %p4569_p3 = scmp.lt.s32.totalorder %s4567_s20, %s4563_s0 }
  0x64   :  { %p4570_p4 = por %p4569_p3, %p4568_p2 }
  0x66   :  { %p4571_p5 = pnand %p4570_p4, %p4564_p1 }
  0x68   :  { %4574 = shalt.err (!%p4571_p5)
}
  0x69   :  { %58 = dma.hbm_to_vmem [thread:$0]  %s5287_s2, 16, %s56_s18, [#allocation6]  }
  0x6a   :  { %s4575_s10 = scalar_lea.hbm %s5291_s6, 16 }
  0x6b   :  { %p4576_p6 = scmp.ne.s32.totalorder %s5291_s6, %s4575_s10  ;;  %p4579_p7 = scmp.lt.u32.totalorder %s4575_s10, %s5291_s6 }
  0x6d   :  { %p4581_p8 = pnand %p4579_p7, %p4576_p6 }
  0x6f   :  { %4584 = shalt.err (!%p4581_p8)
}
  0x70   :  { %s4585_s19 = scalar_lea.vmem %s82_s7, 16  ;;  %s4589_s1 = scalar_lea.vmem %s82_s7, 32 }
  0x71   :  { %p4586_p9 = scmp.ne.s32.totalorder %s82_s7, %s4585_s19  ;;  %p4590_p10 = scmp.lt.s32.totalorder %s82_s7, %s82_s7 }
  0x72   :  { %p4591_p11 = scmp.lt.s32.totalorder %s4589_s1, %s4585_s19 }
  0x74   :  { %p4592_p12 = por %p4591_p11, %p4590_p10 }
  0x76   :  { %p4593_p13 = pnand %p4592_p12, %p4586_p9 }
  0x78   :  { %4596 = shalt.err (!%p4593_p13)
}
  0x79   :  { %84 = dma.hbm_to_vmem [thread:$0]  %s5291_s6, 16, %s82_s7, [#allocation9]  }
  0x7a   :  { %s4688_s30 = smov [#allocation13]   ;;  %s4689_s21 = smov [#allocation16]  }
  0x7b   :  { %s105_s27 = sshll.u32 %s4688_s30, 4  ;;  %s128_s5 = sshll.u32 %s4689_s21, 4  ;;  %s106_s27 = int_to_ptr.vmem [resolvable:$true] %s105_s27  ;;  %s129_s5 = int_to_ptr.vmem [resolvable:$true] %s128_s5 }
  0x7c   :  { %s4597_s0 = scalar_lea.hbm %s5294_s9, 16 }
  0x7d   :  { %p4598_p0 = scmp.ne.s32.totalorder %s5294_s9, %s4597_s0  ;;  %p4601_p1 = scmp.lt.u32.totalorder %s4597_s0, %s5294_s9 }
  0x7f   :  { %p4603_p2 = pnand %p4601_p1, %p4598_p0 }
  0x81   :  { %4606 = shalt.err (!%p4603_p2)
}
  0x82   :  { %s4607_s6 = scalar_lea.vmem %s106_s27, 16  ;;  %s4611_s7 = scalar_lea.vmem %s106_s27, 32 }
  0x83   :  { %p4608_p3 = scmp.ne.s32.totalorder %s106_s27, %s4607_s6  ;;  %p4612_p4 = scmp.lt.s32.totalorder %s106_s27, %s106_s27 }
  0x84   :  { %p4613_p5 = scmp.lt.s32.totalorder %s4611_s7, %s4607_s6 }
  0x86   :  { %p4614_p6 = por %p4613_p5, %p4612_p4 }
  0x88   :  { %p4615_p7 = pnand %p4614_p6, %p4608_p3 }
  0x8a   :  { %4618 = shalt.err (!%p4615_p7)
}
  0x8b   :  { %108 = dma.hbm_to_vmem [thread:$0]  %s5294_s9, 16, %s106_s27, [#allocation12]  }
  0x8c   :  { %s4619_s23 = scalar_lea.hbm %s5297_s12, 4096 }
  0x8d   :  { %p4620_p8 = scmp.ne.s32.totalorder %s5297_s12, %s4619_s23  ;;  %p4623_p9 = scmp.lt.u32.totalorder %s4619_s23, %s5297_s12 }
  0x8f   :  { %p4625_p10 = pnand %p4623_p9, %p4620_p8 }
  0x91   :  { %4628 = shalt.err (!%p4625_p10)
}
  0x92   :  { %s4629_s18 = scalar_lea.vmem %s129_s5, 4096  ;;  %p4634_p12 = scmp.lt.s32.totalorder %s129_s5, %s129_s5 }
  0x93   :  { %p4630_p11 = scmp.ne.s32.totalorder %s129_s5, %s4629_s18  ;;  %p4635_p13 = scmp.lt.s32.totalorder %s4629_s18, %s4629_s18 }
  0x95   :  { %p4636_p0 = por %p4635_p13, %p4634_p12 }
  0x97   :  { %p4637_p1 = pnand %p4636_p0, %p4630_p11 }
  0x99   :  { %4640 = shalt.err (!%p4637_p1)
}
  0x9a   :  { %s4690_s9 = smov 256   ;;  %s4691_s30 = smov 16  }
  0x9b   :  { %134 = dma.hbm_to_vmem [thread:$0]  %s5297_s12, 4096, %s129_s5, [#allocation15], %s4690_s9, %s4690_s9, %s4691_s30  }
  0x9c   :  { %4663 = dma.done.wait [#allocation3], 11520  }
  0x9d   :  { %4664 = vsyncadd [#allocation3], 4294955776 }
  0x9e   :  { %4665 = dma.done.wait [#allocation6], 9616  }
  0x9f   :  { %4666 = vsyncadd [#allocation6], 4294957680 }
  0xa0   :  { %4667 = dma.done.wait [#allocation9], 272  }
  0xa1   :  { %4668 = vsyncadd [#allocation9], 4294967024 }
  0xa2   :  { %4669 = dma.done.wait [#allocation12], 272  }
  0xa3   :  { %4670 = vsyncadd [#allocation12], 4294967024 }
  0xa4   :  { %4671 = dma.done.wait [#allocation15], 5120  }
  0xa5   :  { %4672 = vsyncadd [#allocation15], 4294962176  ;;  %v4168_v0 = vld [vmem:[#allocation5 + $0x40] sm:$0xff]   ;;  %v4172_v4 = vld [vmem:[#allocation5 + $0x48] sm:$0xff]   ;;  %vm1296_vm0 = vcmask 392192   ;;  %vm2057_vm1 = vcmask 1041408  }
  0xa6   :  { %v4169_v1 = vld [vmem:[#allocation5 + $0xc0] sm:$0xff]   ;;  %3678 = vmatprep.subr.bf16.mxu0 %v4168_v0  ;;  %v4173_v5 = vld [vmem:[#allocation5 + $0xc8] sm:$0xff]   ;;  %v4176_v8 = vld [vmem:[#allocation5 + $0x50] sm:$0xff]   ;;  %vm4694_vm2 = vmmov 1   ;;  %vm4695_vm4 = vmmov 0   ;;  %vm2052_vm5 = vcmask 1041409  }
  0xa7   :  { %v4170_v2 = vld [vmem:[#allocation5] sm:$0xff]   ;;  %3748 = vmatprep.subr.bf16.mxu1 %v4169_v1  ;;  %v4174_v6 = vld [vmem:[#allocation5 + $0x8] sm:$0xff]   ;;  %v4177_v9 = vld [vmem:[#allocation5 + $0xd0] sm:$0xff]   ;;  %vm2054_vm6 = vcmask 80896  }
  0xa8   :  { %v4171_v3 = vld [vmem:[#allocation5 + $0x80] sm:$0xff]   ;;  %3679 = vmatpush3.bf16.msra.mxu0 %v4170_v2  ;;  %v4175_v7 = vld [vmem:[#allocation5 + $0x88] sm:$0xff]   ;;  %v4178_v10 = vld [vmem:[#allocation5 + $0x10] sm:$0xff]  }
  0xa9   :  { %3749 = vmatpush3.bf16.msra.mxu1 %v4171_v3  ;;  %3680 = vmatprep.subr.bf16.mxu0 %v4172_v4  ;;  %v4179_v11 = vld [vmem:[#allocation5 + $0x90] sm:$0xff]   ;;  %v4180_v12 = vld [vmem:[#allocation5 + $0x58] sm:$0xff]   ;;  %v4184_v16 = vld [vmem:[#allocation5 + $0x60] sm:$0xff]  }
  0xaa   :  { %3750 = vmatprep.subr.bf16.mxu1 %v4173_v5  ;;  %v4181_v13 = vld [vmem:[#allocation5 + $0xd8] sm:$0xff]   ;;  %v4185_v17 = vld [vmem:[#allocation5 + $0xe0] sm:$0xff]   ;;  %v4188_v20 = vld [vmem:[#allocation5 + $0x68] sm:$0xff]  }
  0xab   :  { %v4182_v14 = vld [vmem:[#allocation5 + $0x18] sm:$0xff]   ;;  %v4186_v18 = vld [vmem:[#allocation5 + $0x20] sm:$0xff]   ;;  %v4189_v21 = vld [vmem:[#allocation5 + $0xe8] sm:$0xff]  }
  0xac   :  { %3681 = vmatpush3.bf16.msra.mxu0 %v4174_v6  ;;  %v4183_v15 = vld [vmem:[#allocation5 + $0x98] sm:$0xff]   ;;  %v4187_v19 = vld [vmem:[#allocation5 + $0xa0] sm:$0xff]   ;;  %v4190_v22 = vld [vmem:[#allocation5 + $0x28] sm:$0xff]  }
  0xad   :  { %3751 = vmatpush3.bf16.msra.mxu1 %v4175_v7  ;;  %3682 = vmatprep.subr.bf16.mxu0 %v4176_v8  ;;  %v4191_v23 = vld [vmem:[#allocation5 + $0xa8] sm:$0xff]   ;;  %v4192_v24 = vld [vmem:[#allocation5 + $0x70] sm:$0xff]   ;;  %v4196_v28 = vld [vmem:[#allocation5 + $0x78] sm:$0xff]  }
  0xae   :  { %3752 = vmatprep.subr.bf16.mxu1 %v4177_v9  ;;  %v4193_v25 = vld [vmem:[#allocation5 + $0xf0] sm:$0xff]   ;;  %v4197_v29 = vld [vmem:[#allocation5 + $0xf8] sm:$0xff]   ;;  %v4206_v36 = vld [vmem:[#allocation5 + $0x140] sm:$0xff]  }
  0xaf   :  { %v4194_v26 = vld [vmem:[#allocation5 + $0x30] sm:$0xff]   ;;  %v4198_v30 = vld [vmem:[#allocation5 + $0x38] sm:$0xff]   ;;  %v4207_v37 = vld [vmem:[#allocation5 + $0x100] sm:$0xff]  }
  0xb0   :  { %3683 = vmatpush3.bf16.msra.mxu0 %v4178_v10  ;;  %v4195_v27 = vld [vmem:[#allocation5 + $0xb0] sm:$0xff]   ;;  %v4199_v31 = vld [vmem:[#allocation5 + $0xb8] sm:$0xff]   ;;  %v4208_v38 = vld [vmem:[#allocation2 + $0x54] ss:$40 sps:$4 sm:$0xff]  }
  0xb1   :  { %3753 = vmatpush3.bf16.msra.mxu1 %v4179_v11  ;;  %3684 = vmatprep.subr.bf16.mxu0 %v4180_v12  ;;  %v4200_v32 = vld [vmem:[#allocation2] ss:$40 sps:$4 sm:$0xff]   ;;  %v4202_v33 = vld [vmem:[#allocation2 + $0x4] ss:$40 sps:$4 sm:$0xff]   ;;  %v4212_v40 = vld [vmem:[#allocation2 + $0x50] ss:$40 sps:$4 sm:$0xff]  }
  0xb2   :  { %3754 = vmatprep.subr.bf16.mxu1 %v4181_v13  ;;  %v4203_v34 = vld [vmem:[#allocation2 + $0x8] ss:$40 sps:$4 sm:$0xff]   ;;  %v4205_v35 = vld [vmem:[#allocation2 + $0xc] ss:$40 sps:$4 sm:$0xff]   ;;  %1356 = vmatprep.mubr.bf16.mxu0 %v4202_v33  ;;  %v4210_v39 = vld [vmem:[#allocation2 + $0x5c] ss:$40 sps:$4 sm:$0xff]  }
  0xb3   :  { %1461 = vmatprep.mubr.bf16.mxu1 %v4205_v35  ;;  %v4213_v41 = vld [vmem:[#allocation2 + $0x58] ss:$40 sps:$4 sm:$0xff]   ;;  %v4216_v44 = vld [vmem:[#allocation2 + $0xa4] ss:$40 sps:$4 sm:$0xff]   ;;  %v4221_v49 = vld [vmem:[#allocation2 + $0xa8] ss:$40 sps:$4 sm:$0xff]  }
  0xb4   :  { %3685 = vmatpush3.bf16.msra.mxu0 %v4182_v14  ;;  %v4214_v42 = vld [vmem:[#allocation5 + $0x148] sm:$0xff]   ;;  %v4218_v45 = vld [vmem:[#allocation2 + $0xac] ss:$40 sps:$4 sm:$0xff]   ;;  %v4222_v46 = vld [vmem:[#allocation5 + $0x150] sm:$0xff]  }
  0xb5   :  { %3755 = vmatpush3.bf16.msra.mxu1 %v4183_v15  ;;  %3686 = vmatprep.subr.bf16.mxu0 %v4184_v16  ;;  %v4215_v43 = vld [vmem:[#allocation5 + $0x108] sm:$0xff]   ;;  %v4223_v47 = vld [vmem:[#allocation5 + $0x110] sm:$0xff]   ;;  %v4230_v52 = vld [vmem:[#allocation5 + $0x158] sm:$0xff]  }
  0xb6   :  { %3756 = vmatprep.subr.bf16.mxu1 %v4185_v17  ;;  %v4220_v48 = vld [vmem:[#allocation2 + $0xa0] ss:$40 sps:$4 sm:$0xff]   ;;  %v4224_v50 = vld [vmem:[#allocation2 + $0xf4] ss:$40 sps:$4 sm:$0xff]   ;;  %v4228_v56 = vld [vmem:[#allocation2 + $0xf0] ss:$40 sps:$4 sm:$0xff]  }
  0xb7   :  { %v4226_v51 = vld [vmem:[#allocation2 + $0xfc] ss:$40 sps:$4 sm:$0xff]   ;;  %v4231_v53 = vld [vmem:[#allocation5 + $0x118] sm:$0xff]   ;;  %v4238_v54 = vld [vmem:[#allocation5 + $0x160] sm:$0xff]  }
  0xb8   :  { %3687 = vmatpush3.bf16.msra.mxu0 %v4186_v18  ;;  %v4239_v55 = vld [vmem:[#allocation5 + $0x120] sm:$0xff]   ;;  %v4229_v57 = vld [vmem:[#allocation2 + $0xf8] ss:$40 sps:$4 sm:$0xff]   ;;  %v4232_v58 = vld [vmem:[#allocation2 + $0x144] ss:$40 sps:$4 sm:$0xff]  }
  0xb9   :  { %3757 = vmatpush3.bf16.msra.mxu1 %v4187_v19  ;;  %3688 = vmatprep.subr.bf16.mxu0 %v4188_v20  ;;  %v4234_v59 = vld [vmem:[#allocation2 + $0x14c] ss:$40 sps:$4 sm:$0xff]   ;;  %v4248_v62 = vld [vmem:[#allocation5 + $0x168] sm:$0xff]   ;;  %v4236_v0 = vld [vmem:[#allocation2 + $0x140] ss:$40 sps:$4 sm:$0xff]  }
  0xba   :  { %3758 = vmatprep.subr.bf16.mxu1 %v4189_v21  ;;  %v4246_v60 = vld [vmem:[#allocation5 + $0x1c0] sm:$0xff]   ;;  %v4249_v63 = vld [vmem:[#allocation5 + $0x128] sm:$0xff]   ;;  %v4258_v6 = vld [vmem:[#allocation5 + $0x1d0] sm:$0xff]  }
  0xbb   :  { %v4247_v61 = vld [vmem:[#allocation5 + $0x180] sm:$0xff]   ;;  %v4250_v1 = vld [vmem:[#allocation5 + $0x1c8] sm:$0xff]   ;;  %v4259_v7 = vld [vmem:[#allocation5 + $0x190] sm:$0xff]  }
  0xbc   :  { %3689 = vmatpush3.bf16.msra.mxu0 %v4190_v22  ;;  %v4237_v2 = vld [vmem:[#allocation2 + $0x148] ss:$40 sps:$4 sm:$0xff]   ;;  %v4240_v3 = vld [vmem:[#allocation2 + $0x194] ss:$40 sps:$4 sm:$0xff]   ;;  %v4260_v8 = vld [vmem:[#allocation5 + $0x170] sm:$0xff]  }
  0xbd   :  { %3759 = vmatpush3.bf16.msra.mxu1 %v4191_v23  ;;  %3690 = vmatprep.subr.bf16.mxu0 %v4192_v24  ;;  %v4255_v4 = vld [vmem:[#allocation5 + $0x188] sm:$0xff]   ;;  %v4261_v10 = vld [vmem:[#allocation5 + $0x1d8] sm:$0xff]   ;;  %v4266_v13 = vld [vmem:[#allocation5 + $0x130] sm:$0xff]  }
  0xbe   :  { %3760 = vmatprep.subr.bf16.mxu1 %v4193_v25  ;;  %v4242_v5 = vld [vmem:[#allocation2 + $0x19c] ss:$40 sps:$4 sm:$0xff]   ;;  %v4244_v9 = vld [vmem:[#allocation2 + $0x190] ss:$40 sps:$4 sm:$0xff]   ;;  %v4253_v14 = vld [vmem:[#allocation2 + $0x1ec] ss:$40 sps:$4 sm:$0xff]  }
  0xbf   :  { %v4245_v11 = vld [vmem:[#allocation2 + $0x198] ss:$40 sps:$4 sm:$0xff]   ;;  %v4251_v12 = vld [vmem:[#allocation2 + $0x1e4] ss:$40 sps:$4 sm:$0xff]   ;;  %v4270_v16 = vld [vmem:[#allocation5 + $0x1e0] sm:$0xff]  }
  0xc0   :  { %3691 = vmatpush3.bf16.msra.mxu0 %v4194_v26  ;;  %v4267_v15 = vld [vmem:[#allocation5 + $0x198] sm:$0xff]   ;;  %v4271_v17 = vld [vmem:[#allocation5 + $0x1a0] sm:$0xff]   ;;  %v4272_v19 = vld [vmem:[#allocation5 + $0x1e8] sm:$0xff]  }
  0xc1   :  { %3761 = vmatpush3.bf16.msra.mxu1 %v4195_v27  ;;  %3692 = vmatprep.subr.bf16.mxu0 %v4196_v28  ;;  %v4256_v18 = vld [vmem:[#allocation2 + $0x1e0] ss:$40 sps:$4 sm:$0xff]   ;;  %v4262_v21 = vld [vmem:[#allocation2 + $0x234] ss:$40 sps:$4 sm:$0xff]   ;;  %v4268_v28 = vld [vmem:[#allocation2 + $0x230] ss:$40 sps:$4 sm:$0xff]  }
  0xc2   :  { %3762 = vmatprep.subr.bf16.mxu1 %v4197_v29  ;;  %v4257_v20 = vld [vmem:[#allocation2 + $0x1e8] ss:$40 sps:$4 sm:$0xff]   ;;  %v4264_v23 = vld [vmem:[#allocation2 + $0x23c] ss:$40 sps:$4 sm:$0xff]   ;;  %vm4916_vm3 = vmpackc.low %vm2057_vm1, %vm4694_vm2 }
  0xc3   :  { %v4277_v22 = vld [vmem:[#allocation5 + $0x178] sm:$0xff]   ;;  %v4278_v24 = vld [vmem:[#allocation5 + $0x1a8] sm:$0xff]   ;;  %v4282_v26 = vld [vmem:[#allocation5 + $0x1f0] sm:$0xff]  }
  0xc4   :  { %3693 = vmatpush3.bf16.msra.mxu0 %v4198_v30  ;;  %v4281_v25 = vld [vmem:[#allocation5 + $0x138] sm:$0xff]   ;;  %v4283_v27 = vld [vmem:[#allocation5 + $0x1b0] sm:$0xff]  }
  0xc5   :  { %3763 = vmatpush3.bf16.msra.mxu1 %v4199_v31  ;;  %3818 = vmatprep.subr.bf16.mxu0 %v4206_v36  ;;  %v4284_v29 = vld [vmem:[#allocation5 + $0x1f8] sm:$0xff]   ;;  %v4269_v30 = vld [vmem:[#allocation2 + $0x238] ss:$40 sps:$4 sm:$0xff]   ;;  %v4692_v31 = vmov 0  }
  0xc6   :  { %3888 = vmatprep.subr.bf16.mxu1 %v4246_v60  ;;  %v4288_v33 = vld [vmem:[#allocation5 + $0x1b8] sm:$0xff]   ;;  %v4318_v60 = vld [vmem:[#allocation2 + $0x15c] ss:$40 sps:$4 sm:$0xff]  }
  0xc7   :  { %1357 = vmatmul.mubr.bf16.vlgmr.msra.gmra.mrb[0].mxu0 %v4200_v32  ;;  %v4273_v32 = vld [vmem:[#allocation2 + $0x284] ss:$40 sps:$4 sm:$0xff]   ;;  %v4279_v35 = vld [vmem:[#allocation2 + $0x280] ss:$40 sps:$4 sm:$0xff]  }
  0xc8   :  { %1462 = vmatmul.mubr.bf16.vlgmr.msra.gmra.mrb[0].mxu1 %v4203_v34  ;;  %3819 = vmatpush3.bf16.msra.mxu0 %v4207_v37  ;;  %v4275_v34 = vld [vmem:[#allocation2 + $0x28c] ss:$40 sps:$4 sm:$0xff]   ;;  %v4280_v36 = vld [vmem:[#allocation2 + $0x288] ss:$40 sps:$4 sm:$0xff]  }
  0xc9   :  { %1364 = vmatprep.mubr.bf16.mxu0 %v4208_v38  ;;  %1469 = vmatprep.mubr.bf16.mxu1 %v4210_v39  ;;  %v4287_v37 = vld [vmem:[#allocation2 + $0x14] ss:$40 sps:$4 sm:$0xff]   ;;  %v4285_v39 = vld [vmem:[#allocation2 + $0x10] ss:$40 sps:$4 sm:$0xff]  }
  0xca   :  { %3820 = vmatprep.subr.bf16.mxu0 %v4214_v42  ;;  %3889 = vmatpush3.bf16.msra.mxu1 %v4247_v61  ;;  %v4291_v38 = vld [vmem:[#allocation2 + $0x1c] ss:$40 sps:$4 sm:$0xff]  }
  0xcb   :  { %3890 = vmatprep.subr.bf16.mxu1 %v4250_v1  ;;  %v4293_v42 = vld [vmem:[#allocation2 + $0x64] ss:$40 sps:$4 sm:$0xff]  }
  0xcc   :  { %3821 = vmatpush3.bf16.msra.mxu0 %v4215_v43  ;;  %v4297_v43 = vld [vmem:[#allocation2 + $0x6c] ss:$40 sps:$4 sm:$0xff]   ;;  %v4327_v61 = vld [vmem:[#allocation5 + $0x230] sm:$0xff]  }
  0xcd   :  { %3822 = vmatprep.subr.bf16.mxu0 %v4222_v46  ;;  %v4299_v46 = vld [vmem:[#allocation2 + $0x68] ss:$40 sps:$4 sm:$0xff]   ;;  %v4322_v1 = vld [vmem:[#allocation2 + $0x1a4] ss:$40 sps:$4 sm:$0xff]  }
  0xce   :  { %3891 = vmatpush3.bf16.msra.mxu1 %v4255_v4  ;;  %v4343_v4 = vld [vmem:[#allocation5 + $0x248] sm:$0xff]  }
  0xcf   :  { %1365 = vmatmul.mubr.bf16.gmra.mrb[4].mxu0 %v4212_v40  ;;  %3892 = vmatprep.subr.bf16.mxu1 %v4258_v6  ;;  %v4289_v40 = vld [vmem:[#allocation2 + $0x18] ss:$40 sps:$4 sm:$0xff]   ;;  %v4328_v6 = vld [vmem:[#allocation2 + $0x1a8] ss:$40 sps:$4 sm:$0xff]  }
  0xd0   :  { %1470 = vmatmul.mubr.bf16.gmra.mrb[4].mxu1 %v4213_v41  ;;  %1372 = vmatprep.mubr.bf16.mxu0 %v4216_v44  ;;  %v4292_v41 = vld [vmem:[#allocation5 + $0x200] sm:$0xff]   ;;  %v4296_v44 = vld [vmem:[#allocation5 + $0x208] sm:$0xff]  }
  0xd1   :  { %1477 = vmatprep.mubr.bf16.mxu1 %v4218_v45  ;;  %3823 = vmatpush3.bf16.msra.mxu0 %v4223_v47  ;;  %v4295_v45 = vld [vmem:[#allocation2 + $0x60] ss:$40 sps:$4 sm:$0xff]   ;;  %v4300_v47 = vld [vmem:[#allocation2 + $0xb4] ss:$40 sps:$4 sm:$0xff]  }
  0xd2   :  { %3824 = vmatprep.subr.bf16.mxu0 %v4230_v52  ;;  %3893 = vmatpush3.bf16.msra.mxu1 %v4259_v7  ;;  %v4306_v52 = vld [vmem:[#allocation2 + $0xb8] ss:$40 sps:$4 sm:$0xff]   ;;  %v4329_v7 = vld [vmem:[#allocation2 + $0x1f4] ss:$40 sps:$4 sm:$0xff]  }
  0xd3   :  { %3894 = vmatprep.subr.bf16.mxu1 %v4261_v10  ;;  %v4332_v10 = vld [vmem:[#allocation2 + $0x1f0] ss:$40 sps:$4 sm:$0xff]  }
  0xd5   :  { %3825 = vmatpush3.bf16.msra.mxu0 %v4231_v53  ;;  %v4308_v53 = vld [vmem:[#allocation2 + $0x104] ss:$40 sps:$4 sm:$0xff]  }
  0xd6   :  { %3826 = vmatprep.subr.bf16.mxu0 %v4238_v54  ;;  %3895 = vmatpush3.bf16.msra.mxu1 %v4267_v15  ;;  %v4311_v54 = vld [vmem:[#allocation2 + $0x10c] ss:$40 sps:$4 sm:$0xff]   ;;  %v4342_v15 = vld [vmem:[#allocation2 + $0x248] ss:$40 sps:$4 sm:$0xff]  }
  0xd7   :  { %1373 = vmatmul.mubr.bf16.gmra.mrb[8].mxu0 %v4220_v48  ;;  %3896 = vmatprep.subr.bf16.mxu1 %v4270_v16  ;;  %v4302_v48 = vld [vmem:[#allocation5 + $0x210] sm:$0xff]   ;;  %v4344_v16 = vld [vmem:[#allocation2 + $0x294] ss:$40 sps:$4 sm:$0xff]  }
  0xd8   :  { %1478 = vmatmul.mubr.bf16.gmra.mrb[8].mxu1 %v4221_v49  ;;  %1380 = vmatprep.mubr.bf16.mxu0 %v4224_v50  ;;  %v4304_v49 = vld [vmem:[#allocation2 + $0xbc] ss:$40 sps:$4 sm:$0xff]   ;;  %v4307_v50 = vld [vmem:[#allocation5 + $0x218] sm:$0xff]  }
  0xd9   :  { %1485 = vmatprep.mubr.bf16.mxu1 %v4226_v51  ;;  %3827 = vmatpush3.bf16.msra.mxu0 %v4239_v55  ;;  %v4303_v51 = vld [vmem:[#allocation2 + $0xb0] ss:$40 sps:$4 sm:$0xff]  }
  0xda   :  { %3828 = vmatprep.subr.bf16.mxu0 %v4248_v62  ;;  %3897 = vmatpush3.bf16.msra.mxu1 %v4271_v17  ;;  %v4314_v55 = vld [vmem:[#allocation5 + $0x220] sm:$0xff]   ;;  %v4347_v17 = vld [vmem:[#allocation2 + $0x29c] ss:$40 sps:$4 sm:$0xff]  }
  0xdb   :  { %3898 = vmatprep.subr.bf16.mxu1 %v4272_v19  ;;  %v4317_v62 = vld [vmem:[#allocation2 + $0x150] ss:$40 sps:$4 sm:$0xff]  }
  0xdc   :  { %v4349_v19 = vld [vmem:[#allocation2 + $0x298] ss:$40 sps:$4 sm:$0xff]  }
  0xdd   :  { %3829 = vmatpush3.bf16.msra.mxu0 %v4249_v63  ;;  %v4331_v63 = vld [vmem:[#allocation5 + $0x238] sm:$0xff]  }
  0xde   :  { %3830 = vmatprep.subr.bf16.mxu0 %v4260_v8  ;;  %3899 = vmatpush3.bf16.msra.mxu1 %v4278_v24  ;;  %v4333_v8 = vld [vmem:[#allocation2 + $0x1fc] ss:$40 sps:$4 sm:$0xff]  }
  0xdf   :  { %1381 = vmatmul.mubr.bf16.gmra.mrb[12].mxu0 %v4228_v56  ;;  %3900 = vmatprep.subr.bf16.mxu1 %v4282_v26  ;;  %v4321_v56 = vld [vmem:[#allocation5 + $0x228] sm:$0xff]   ;;  %v4357_v24 = vld [vmem:[#allocation2 + $0xc4] ss:$40 sps:$4 sm:$0xff]  }
  0xe0   :  { %1486 = vmatmul.mubr.bf16.gmra.mrb[12].mxu1 %v4229_v57  ;;  %1388 = vmatprep.mubr.bf16.mxu0 %v4232_v58  ;;  %v4310_v57 = vld [vmem:[#allocation2 + $0x100] ss:$40 sps:$4 sm:$0xff]   ;;  %v4360_v26 = vld [vmem:[#allocation2 + $0x114] ss:$40 sps:$4 sm:$0xff]  }
  0xe1   :  { %1493 = vmatprep.mubr.bf16.mxu1 %v4234_v59  ;;  %3831 = vmatpush3.bf16.msra.mxu0 %v4266_v13  ;;  %v4313_v58 = vld [vmem:[#allocation2 + $0x108] ss:$40 sps:$4 sm:$0xff]   ;;  %v4315_v59 = vld [vmem:[#allocation2 + $0x154] ss:$40 sps:$4 sm:$0xff]  }
  0xe2   :  { %3832 = vmatprep.subr.bf16.mxu0 %v4277_v22  ;;  %3901 = vmatpush3.bf16.msra.mxu1 %v4283_v27  ;;  %v4340_v13 = vld [vmem:[#allocation2 + $0x24c] ss:$40 sps:$4 sm:$0xff]   ;;  %v4362_v27 = vld [vmem:[#allocation2 + $0x110] ss:$40 sps:$4 sm:$0xff]  }
  0xe3   :  { %3902 = vmatprep.subr.bf16.mxu1 %v4284_v29  ;;  %v4354_v22 = vld [vmem:[#allocation2 + $0x74] ss:$40 sps:$4 sm:$0xff]   ;;  %v4365_v29 = vld [vmem:[#allocation2 + $0x160] ss:$40 sps:$4 sm:$0xff]  }
  0xe5   :  { %3833 = vmatpush3.bf16.msra.mxu0 %v4281_v25  ;;  %v4359_v25 = vld [vmem:[#allocation2 + $0xc0] ss:$40 sps:$4 sm:$0xff]  }
  0xe6   :  { %1744 = vmatprep.subr.bf16.mxu0 %v4692_v31  ;;  %3903 = vmatpush3.bf16.msra.mxu1 %v4288_v33  ;;  %v2040_v33 = vld [vmem:[#allocation8] sm:$0xff] }
  0xe7   :  { %1389 = vmatmul.mubr.bf16.gmra.mrb[16].mxu0 %v4236_v0  ;;  %v4320_v0 = vld [vmem:[#allocation2 + $0x158] ss:$40 sps:$4 sm:$0xff]  }
  0xe8   :  { %1494 = vmatmul.mubr.bf16.gmra.mrb[16].mxu1 %v4237_v2  ;;  %1396 = vmatprep.mubr.bf16.mxu0 %v4240_v3  ;;  %v4325_v2 = vld [vmem:[#allocation2 + $0x1ac] ss:$40 sps:$4 sm:$0xff]  }
  0xe9   :  { %1501 = vmatprep.mubr.bf16.mxu1 %v4242_v5  ;;  %v4336_v3 = vld [vmem:[#allocation5 + $0x240] sm:$0xff]   ;;  %v4324_v5 = vld [vmem:[#allocation2 + $0x1a0] ss:$40 sps:$4 sm:$0xff]  }
  0xef   :  { %1397 = vmatmul.mubr.bf16.gmra.mrb[20].mxu0 %v4244_v9  ;;  %v4350_v9 = vld [vmem:[#allocation5 + $0x250] sm:$0xff]  }
  0xf0   :  { %1502 = vmatmul.mubr.bf16.gmra.mrb[20].mxu1 %v4245_v11  ;;  %1404 = vmatprep.mubr.bf16.mxu0 %v4251_v12  ;;  %v4335_v11 = vld [vmem:[#allocation2 + $0x1f8] ss:$40 sps:$4 sm:$0xff]   ;;  %v4337_v12 = vld [vmem:[#allocation2 + $0x244] ss:$40 sps:$4 sm:$0xff]  }
  0xf1   :  { %1509 = vmatprep.mubr.bf16.mxu1 %v4253_v14  ;;  %v4339_v14 = vld [vmem:[#allocation2 + $0x240] ss:$40 sps:$4 sm:$0xff]  }
  0xf7   :  { %1405 = vmatmul.mubr.bf16.gmra.mrb[24].mxu0 %v4256_v18  ;;  %v4346_v18 = vld [vmem:[#allocation2 + $0x290] ss:$40 sps:$4 sm:$0xff]  }
  0xf8   :  { %1510 = vmatmul.mubr.bf16.gmra.mrb[24].mxu1 %v4257_v20  ;;  %1412 = vmatprep.mubr.bf16.mxu0 %v4262_v21  ;;  %v4353_v20 = vld [vmem:[#allocation2 + $0x24] ss:$40 sps:$4 sm:$0xff]   ;;  %v4351_v21 = vld [vmem:[#allocation2 + $0x20] ss:$40 sps:$4 sm:$0xff]  }
  0xf9   :  { %1517 = vmatprep.mubr.bf16.mxu1 %v4264_v23  ;;  %v4356_v23 = vld [vmem:[#allocation2 + $0x70] ss:$40 sps:$4 sm:$0xff]  }
  0xff   :  { %1413 = vmatmul.mubr.bf16.gmra.mrb[28].mxu0 %v4268_v28  ;;  %v4363_v28 = vld [vmem:[#allocation2 + $0x164] ss:$40 sps:$4 sm:$0xff]  }
 0x100   :  { %1518 = vmatmul.mubr.bf16.gmra.mrb[28].mxu1 %v4269_v30  ;;  %1420 = vmatprep.mubr.bf16.mxu0 %v4273_v32  ;;  %v4693_v30 = vmov 0.0|0.0   ;;  %v4366_v32 = vld [vmem:[#allocation2 + $0x1b4] ss:$40 sps:$4 sm:$0xff]  }
 0x101   :  { %1525 = vmatprep.mubr.bf16.mxu1 %v4275_v34  ;;  %4106 = vmatprep.subr.bf16.mxu1 %v4693_v30  ;;  %v2041_v34 = vld [vmem:[#allocation8 + $0x8] sm:$0x3] }
 0x107   :  { %1421 = vmatmul.mubr.bf16.gmra.mrb[32].mxu0 %v4279_v35  ;;  %v4914_v35 = vpack.c.bf16 %v2041_v34, %v2040_v33  ;;  %v2225_v34 = vld [vmem:[%s5289_s4 + $0x2] sm:$0x1] }
 0x108   :  { %1526 = vmatmul.mubr.bf16.gmra.mrb[32].mxu1 %v4280_v36  ;;  %1566 = vmatprep.mubr.bf16.mxu0 %v4287_v37  ;;  %v4368_v37 = vld [vmem:[#allocation2 + $0x1b0] ss:$40 sps:$4 sm:$0xff]  }
 0x109   :  { %1671 = vmatprep.mubr.bf16.mxu1 %v4291_v38  ;;  %v4369_v38 = vld [vmem:[#allocation2 + $0x204] ss:$40 sps:$4 sm:$0xff]  }
 0x10f   :  { %1567 = vmatmul.mubr.bf16.vlgmr.msra.gmra.mrb[36].mxu0 %v4285_v39  ;;  %v4371_v39 = vld [vmem:[#allocation2 + $0x200] ss:$40 sps:$4 sm:$0xff]  }
 0x110   :  { %1745 = vmatpush1.bf16.msra.mxu0 %v4292_v41  ;;  %1672 = vmatmul.mubr.bf16.vlgmr.msra.gmra.mrb[36].mxu1 %v4289_v40  ;;  %v4372_v40 = vld [vmem:[#allocation2 + $0x254] ss:$40 sps:$4 sm:$0xff]   ;;  %v4374_v41 = vld [vmem:[#allocation2 + $0x250] ss:$40 sps:$4 sm:$0xff]  }
 0x111   :  { %1574 = vmatprep.mubr.bf16.mxu0 %v4293_v42  ;;  %1746 = vmatprep.subr.bf16.mxu0 %v4692_v31  ;;  %v4375_v42 = vld [vmem:[#allocation2 + $0x2a4] ss:$40 sps:$4 sm:$0xff]  }
 0x112   :  { %1679 = vmatprep.mubr.bf16.mxu1 %v4297_v43  ;;  %4109 = vmatpush3.bf16.msk.msra.mxu1 %vm4916_vm3, %v4914_v35  ;;  %v4377_v43 = vld [vmem:[#allocation2 + $0x2a0] ss:$40 sps:$4 sm:$0xff]  }
 0x113   :  { %4110 = vmatprep.subr.bf16.mxu1 %v4693_v30 }
 0x114   :  { %1747 = vmatpush1.bf16.msra.mxu0 %v4296_v44 }
 0x115   :  { %1748 = vmatprep.subr.bf16.mxu0 %v4692_v31 }
 0x117   :  { %1575 = vmatmul.mubr.bf16.gmra.mrb[40].mxu0 %v4295_v45 }
 0x118   :  { %1680 = vmatmul.mubr.bf16.gmra.mrb[40].mxu1 %v4299_v46  ;;  %1582 = vmatprep.mubr.bf16.mxu0 %v4300_v47 }
 0x119   :  { %1749 = vmatpush1.bf16.msra.mxu0 %v4302_v48  ;;  %1687 = vmatprep.mubr.bf16.mxu1 %v4304_v49 }
 0x11a   :  { %1750 = vmatprep.subr.bf16.mxu0 %v4692_v31 }
 0x11d   :  { %1751 = vmatpush1.bf16.msra.mxu0 %v4307_v50 }
 0x11e   :  { %1752 = vmatprep.subr.bf16.mxu0 %v4692_v31 }
 0x11f   :  { %1583 = vmatmul.mubr.bf16.gmra.mrb[44].mxu0 %v4303_v51 }
 0x120   :  { %1688 = vmatmul.mubr.bf16.gmra.mrb[44].mxu1 %v4306_v52  ;;  %1590 = vmatprep.mubr.bf16.mxu0 %v4308_v53 }
 0x121   :  { %1695 = vmatprep.mubr.bf16.mxu1 %v4311_v54  ;;  %1753 = vmatpush1.bf16.msra.mxu0 %v4314_v55 }
 0x122   :  { %1754 = vmatprep.subr.bf16.mxu0 %v4692_v31 }
 0x125   :  { %1755 = vmatpush1.bf16.msra.mxu0 %v4321_v56 }
 0x126   :  { %1756 = vmatprep.subr.bf16.mxu0 %v4692_v31 }
 0x127   :  { %1591 = vmatmul.mubr.bf16.gmra.mrb[48].mxu0 %v4310_v57 }
 0x128   :  { %1696 = vmatmul.mubr.bf16.gmra.mrb[48].mxu1 %v4313_v58  ;;  %1598 = vmatprep.mubr.bf16.mxu0 %v4315_v59 }
 0x129   :  { %1703 = vmatprep.mubr.bf16.mxu1 %v4318_v60  ;;  %1757 = vmatpush1.bf16.msra.mxu0 %v4327_v61 }
 0x12a   :  { %1758 = vmatprep.subr.bf16.mxu0 %v4692_v31 }
 0x12d   :  { %1759 = vmatpush1.bf16.msra.mxu0 %v4331_v63 }
 0x12e   :  { %1760 = vmatprep.subr.bf16.mxu0 %v4692_v31 }
 0x12f   :  { %1599 = vmatmul.mubr.bf16.gmra.mrb[52].mxu0 %v4317_v62 }
 0x130   :  { %1704 = vmatmul.mubr.bf16.gmra.mrb[52].mxu1 %v4320_v0  ;;  %1606 = vmatprep.mubr.bf16.mxu0 %v4322_v1 }
 0x131   :  { %1711 = vmatprep.mubr.bf16.mxu1 %v4325_v2  ;;  %1761 = vmatpush1.bf16.msra.mxu0 %v4336_v3  ;;  %v2039_v3 = vld [vmem:[%s5289_s4 + $0x10] sm:$0x1] }
 0x132   :  { %1762 = vmatprep.subr.bf16.mxu0 %v4692_v31 }
 0x135   :  { %1763 = vmatpush1.bf16.msra.mxu0 %v4343_v4 }
 0x136   :  { %1764 = vmatprep.subr.bf16.mxu0 %v4692_v31 }
 0x137   :  { %1607 = vmatmul.mubr.bf16.gmra.mrb[56].mxu0 %v4324_v5 }
 0x138   :  { %1712 = vmatmul.mubr.bf16.gmra.mrb[56].mxu1 %v4328_v6  ;;  %1614 = vmatprep.mubr.bf16.mxu0 %v4329_v7  ;;  %v2051_v6 = vrot.slane %v2039_v3, 7 }
 0x139   :  { %1719 = vmatprep.mubr.bf16.mxu1 %v4333_v8  ;;  %1765 = vmatpush1.bf16.msra.mxu0 %v4350_v9  ;;  %v2038_v9 = vld [vmem:[%s5289_s4] sm:$0x1] }
 0x13f   :  { %1615 = vmatmul.mubr.bf16.gmra.mrb[60].mxu0 %v4332_v10  ;;  %v4696_v10 = vmov 0.0  }
 0x140   :  { %1720 = vmatmul.mubr.bf16.gmra.mrb[60].mxu1 %v4335_v11  ;;  %1622 = vmatprep.mubr.bf16.mxu0 %v4337_v12  ;;  %v2053_v12 = vsel %vm2052_vm5, %v2051_v6, %v2038_v9 }
 0x141   :  { %1727 = vmatprep.mubr.bf16.mxu1 %v4340_v13  ;;  %4086 = vmatprep.subr.bf16.mxu0 %v4696_v10  ;;  %v2140_v13 = vld [vmem:[%s5289_s4 + $0x11] sm:$0x1] }
 0x147   :  { %1623 = vmatmul.mubr.bf16.gmra.mrb[64].mxu0 %v4339_v14 }
 0x148   :  { %1728 = vmatmul.mubr.bf16.gmra.mrb[64].mxu1 %v4342_v15  ;;  %1630 = vmatprep.mubr.bf16.mxu0 %v4344_v16  ;;  %v2143_v15 = vrot.slane %v2140_v13, 7 }
 0x149   :  { %1735 = vmatprep.mubr.bf16.mxu1 %v4347_v17 }
 0x14f   :  { %1631 = vmatmul.mubr.bf16.gmra.mrb[68].mxu0 %v4346_v18  ;;  %v2139_v18 = vld [vmem:[%s5289_s4 + $0x1] sm:$0x1] }
 0x150   :  { %1736 = vmatmul.mubr.bf16.gmra.mrb[68].mxu1 %v4349_v19  ;;  %3589 = vmatprep.mubr.msk.bf16.mxu0 %vm1296_vm0, %v4353_v20 }
 0x151   :  { %4007 = vmatprep.mubr.msk.f32.mxu1 %vm4695_vm4, %v4696_v10 }
 0x157   :  { %1777 = vmatmul.mubr.bf16.vlgmr.msra.gmra.mrb[72].mxu0 %v4351_v21 }
 0x158   :  { %3590 = vmatprep.mubr.msk.bf16.mxu0 %vm1296_vm0, %v4354_v22  ;;  %4008 = vmatmul.mubr.msk.f32.vlgmr.msra.gmra.mrb[72].mxu1 %vm2054_vm6, %v2053_v12  ;;  %v2144_v22 = vsel %vm2052_vm5, %v2143_v15, %v2139_v18  ;;  %v2570_v15 = vld [vmem:[%s5289_s4 + $0x16] sm:$0x1] }
 0x159   :  { %4113 = vmatpush3.bf16.msk.msra.mxu1 %vm4916_vm3, %v4914_v35  ;;  %4014 = vmatprep.mubr.msk.f32.mxu1 %vm4695_vm4, %v4696_v10  ;;  %v2573_v18 = vrot.slane %v2570_v15, 7 }
 0x15a   :  { %4114 = vmatprep.subr.bf16.mxu1 %v4693_v30 }
 0x15c   :  { %4015 = vmatmul.mubr.msk.f32.vlgmr.msra.gmra.mrb[74].mxu1 %vm2054_vm6, %v2144_v22 }
 0x15d   :  { %4117 = vmatpush3.bf16.msk.msra.mxu1 %vm4916_vm3, %v4914_v35  ;;  %4021 = vmatprep.mubr.msk.f32.mxu1 %vm4695_vm4, %v4696_v10 }
 0x15e   :  { %4118 = vmatprep.subr.bf16.mxu1 %v4693_v30 }
 0x15f   :  { %1785 = vmatmul.mubr.bf16.gmra.mrb[76].mxu0 %v4356_v23 }
 0x160   :  { %3591 = vmatprep.mubr.msk.bf16.mxu0 %vm1296_vm0, %v4357_v24 }
 0x167   :  { %1793 = vmatmul.mubr.bf16.gmra.mrb[80].mxu0 %v4359_v25 }
 0x168   :  { %3592 = vmatprep.mubr.msk.bf16.mxu0 %vm1296_vm0, %v4360_v26  ;;  %v2226_v26 = vld [vmem:[%s5289_s4 + $0x12] sm:$0x1] }
 0x16f   :  { %1801 = vmatmul.mubr.bf16.gmra.mrb[84].mxu0 %v4362_v27 }
 0x170   :  { %3593 = vmatprep.mubr.msk.bf16.mxu0 %vm1296_vm0, %v4363_v28 }
 0x177   :  { %1809 = vmatmul.mubr.bf16.gmra.mrb[88].mxu0 %v4365_v29  ;;  %v2229_v29 = vrot.slane %v2226_v26, 7 }
 0x178   :  { %3594 = vmatprep.mubr.msk.bf16.mxu0 %vm1296_vm0, %v4366_v32 }
 0x17f   :  { %1817 = vmatmul.mubr.bf16.gmra.mrb[92].mxu0 %v4368_v37  ;;  %v2230_v37 = vsel %vm2052_vm5, %v2229_v29, %v2225_v34  ;;  %v2655_v29 = vld [vmem:[%s5289_s4 + $0x7] sm:$0x1] }
 0x180   :  { %3595 = vmatprep.mubr.msk.bf16.mxu0 %vm1296_vm0, %v4369_v38  ;;  %4022 = vmatmul.mubr.msk.f32.vlgmr.msra.gmra.mrb[76].mxu1 %vm2054_vm6, %v2230_v37 }
 0x181   :  { %4121 = vmatpush3.bf16.msk.msra.mxu1 %vm4916_vm3, %v4914_v35  ;;  %4028 = vmatprep.mubr.msk.f32.mxu1 %vm4695_vm4, %v4696_v10 }
 0x182   :  { %4122 = vmatprep.subr.bf16.mxu1 %v4693_v30 }
 0x187   :  { %1825 = vmatmul.mubr.bf16.gmra.mrb[96].mxu0 %v4371_v39  ;;  %v2312_v39 = vld [vmem:[%s5289_s4 + $0x13] sm:$0x1] }
 0x188   :  { %3596 = vmatprep.mubr.msk.bf16.mxu0 %vm1296_vm0, %v4372_v40 }
 0x18f   :  { %1833 = vmatmul.mubr.bf16.gmra.mrb[100].mxu0 %v4374_v41  ;;  %v2315_v41 = vrot.slane %v2312_v39, 7 }
 0x190   :  { %3597 = vmatprep.mubr.msk.bf16.mxu0 %vm1296_vm0, %v4375_v42 }
 0x197   :  { %1841 = vmatmul.mubr.bf16.gmra.mrb[104].mxu0 %v4377_v43 }
 0x198   :  { %4102 = vmatprep.mubr.msk.bf16.mxu0 %vm4695_vm4, %v4696_v10 }
 0x19a   :  { %v3694_v44 = vpop.f32.mrb[0].mxu0 }
 0x19b   :  { %v3764_v45 = vpop.f32.mrb[0].mxu1  ;;  %v3695_v46 = vpop.f32.mrb[1].mxu0 }
 0x19c   :  { %v3696_v47 = vadd.f32 %v3695_v46, %v3694_v44  ;;  %v3765_v48 = vpop.f32.mrb[1].mxu1  ;;  %v3697_v49 = vpop.f32.mrb[2].mxu0  ;;  %v2311_v44 = vld [vmem:[%s5289_s4 + $0x3] sm:$0x1] }
 0x19d   :  { %v3766_v50 = vadd.f32 %v3765_v48, %v3764_v45  ;;  %v3767_v51 = vpop.f32.mrb[2].mxu1  ;;  %v3698_v52 = vpop.f32.mrb[3].mxu0  ;;  %v2316_v48 = vsel %vm2052_vm5, %v2315_v41, %v2311_v44 }
 0x19e   :  { %v3699_v53 = vadd.f32 %v3698_v52, %v3697_v49  ;;  %v3768_v54 = vpop.f32.mrb[3].mxu1  ;;  %v2398_v52 = vld [vmem:[%s5289_s4 + $0x14] sm:$0x1]  ;;  %4029 = vmatmul.mubr.msk.f32.vlgmr.msra.gmra.mrb[78].mxu1 %vm2054_vm6, %v2316_v48 }
 0x19f   :  { %v4928_v55 = vadd.f32 %v3766_v50, %v3696_v47  ;;  %v3769_v56 = vadd.f32 %v3768_v54, %v3767_v51  ;;  %4125 = vmatpush3.bf16.msk.msra.mxu1 %vm4916_vm3, %v4914_v35  ;;  %4035 = vmatprep.mubr.msk.f32.mxu1 %vm4695_vm4, %v4696_v10 }
 0x1a0   :  { %4126 = vmatprep.subr.bf16.mxu1 %v4693_v30 }
 0x1a1   :  { %v4930_v57 = vadd.f32 %v3769_v56, %v3699_v53  ;;  %v2401_v56 = vrot.slane %v2398_v52, 7 }
 0x1a2   :  { %v3700_v58 = vpop.f32.mrb[4].mxu0 }
 0x1a3   :  { %v3770_v59 = vpop.f32.mrb[4].mxu1  ;;  %v3701_v60 = vpop.f32.mrb[5].mxu0 }
 0x1a4   :  { %v3702_v61 = vadd.f32 %v3701_v60, %v3700_v58  ;;  %v3771_v62 = vpop.f32.mrb[5].mxu1  ;;  %v3703_v63 = vpop.f32.mrb[6].mxu0  ;;  %v2397_v60 = vld [vmem:[%s5289_s4 + $0x4] sm:$0x1] }
 0x1a5   :  { %v3772_v0 = vadd.f32 %v3771_v62, %v3770_v59  ;;  %v3773_v1 = vpop.f32.mrb[6].mxu1  ;;  %v3704_v2 = vpop.f32.mrb[7].mxu0 }
 0x1a6   :  { %v3705_v4 = vadd.f32 %v3704_v2, %v3703_v63  ;;  %v3774_v5 = vpop.f32.mrb[7].mxu1  ;;  %v2484_v63 = vld [vmem:[%s5289_s4 + $0x15] sm:$0x1] }
 0x1a7   :  { %v4935_v7 = vadd.f32 %v3772_v0, %v3702_v61  ;;  %v3775_v8 = vadd.f32 %v3774_v5, %v3773_v1  ;;  %v2402_v61 = vsel %vm2052_vm5, %v2401_v56, %v2397_v60  ;;  %v2487_v1 = vrot.slane %v2484_v63, 7 }
 0x1a8   :  { %4036 = vmatmul.mubr.msk.f32.vlgmr.msra.gmra.mrb[80].mxu1 %vm2054_vm6, %v2402_v61 }
 0x1a9   :  { %v4943_v11 = vadd.f32 %v3775_v8, %v3705_v4  ;;  %4129 = vmatpush3.bf16.msk.msra.mxu1 %vm4916_vm3, %v4914_v35  ;;  %4042 = vmatprep.mubr.msk.f32.mxu1 %vm4695_vm4, %v4696_v10  ;;  %v2483_v4 = vld [vmem:[%s5289_s4 + $0x5] sm:$0x1] }
 0x1aa   :  { %v3706_v14 = vpop.f32.mrb[8].mxu0  ;;  %v2488_v9 = vsel %vm2052_vm5, %v2487_v1, %v2483_v4  ;;  %4130 = vmatprep.subr.bf16.mxu1 %v4693_v30 }
 0x1ab   :  { %v3776_v16 = vpop.f32.mrb[8].mxu1  ;;  %v3707_v17 = vpop.f32.mrb[9].mxu0 }
 0x1ac   :  { %v3708_v19 = vadd.f32 %v3707_v17, %v3706_v14  ;;  %v3777_v20 = vpop.f32.mrb[9].mxu1  ;;  %v3709_v21 = vpop.f32.mrb[10].mxu0  ;;  %4043 = vmatmul.mubr.msk.f32.vlgmr.msra.gmra.mrb[82].mxu1 %vm2054_vm6, %v2488_v9 }
 0x1ad   :  { %v3778_v23 = vadd.f32 %v3777_v20, %v3776_v16  ;;  %v3779_v24 = vpop.f32.mrb[10].mxu1  ;;  %v3710_v25 = vpop.f32.mrb[11].mxu0  ;;  %4133 = vmatpush3.bf16.msk.msra.mxu1 %vm4916_vm3, %v4914_v35  ;;  %4049 = vmatprep.mubr.msk.f32.mxu1 %vm4695_vm4, %v4696_v10 }
 0x1ae   :  { %v3711_v27 = vadd.f32 %v3710_v25, %v3709_v21  ;;  %v3780_v28 = vpop.f32.mrb[11].mxu1  ;;  %v2569_v21 = vld [vmem:[%s5289_s4 + $0x6] sm:$0x1]  ;;  %4134 = vmatprep.subr.bf16.mxu1 %v4693_v30 }
 0x1af   :  { %v4966_v32 = vadd.f32 %v3778_v23, %v3708_v19  ;;  %v3781_v33 = vadd.f32 %v3780_v28, %v3779_v24  ;;  %v2574_v22 = vsel %vm2052_vm5, %v2573_v18, %v2569_v21  ;;  %v2656_v24 = vld [vmem:[%s5289_s4 + $0x17] sm:$0x1]  ;;  %v4379_v21 = vld [vmem:[%s5293_s8] sm:$0xff]  }
 0x1b0   :  { %4050 = vmatmul.mubr.msk.f32.vlgmr.msra.gmra.mrb[84].mxu1 %vm2054_vm6, %v2574_v22  ;;  %v2659_v26 = vrot.slane %v2656_v24, 7 }
 0x1b1   :  { %v4978_v38 = vadd.f32 %v3781_v33, %v3711_v27  ;;  %4137 = vmatpush3.bf16.msk.msra.mxu1 %vm4916_vm3, %v4914_v35  ;;  %4056 = vmatprep.mubr.msk.f32.mxu1 %vm4695_vm4, %v4696_v10 }
 0x1b2   :  { %v3712_v40 = vpop.f32.mrb[12].mxu0  ;;  %v2660_v39 = vsel %vm2052_vm5, %v2659_v26, %v2655_v29  ;;  %4138 = vmatprep.subr.bf16.mxu1 %v4693_v30  ;;  %v2741_v30 = vld [vmem:[%s5289_s4 + $0x8] sm:$0x1] }
 0x1b3   :  { %v3782_v42 = vpop.f32.mrb[12].mxu1  ;;  %v3713_v43 = vpop.f32.mrb[13].mxu0 }
 0x1b4   :  { %v3714_v45 = vadd.f32 %v3713_v43, %v3712_v40  ;;  %v3783_v46 = vpop.f32.mrb[13].mxu1  ;;  %v3715_v47 = vpop.f32.mrb[14].mxu0  ;;  %v2742_v43 = vld [vmem:[%s5289_s4 + $0x18] sm:$0x1]  ;;  %4057 = vmatmul.mubr.msk.f32.vlgmr.msra.gmra.mrb[86].mxu1 %vm2054_vm6, %v2660_v39 }
 0x1b5   :  { %v3784_v49 = vadd.f32 %v3783_v46, %v3782_v42  ;;  %v3785_v50 = vpop.f32.mrb[14].mxu1  ;;  %v3716_v51 = vpop.f32.mrb[15].mxu0  ;;  %v2745_v46 = vrot.slane %v2742_v43, 7  ;;  %4141 = vmatpush3.bf16.msk.msra.mxu1 %vm4916_vm3, %v4914_v35  ;;  %4063 = vmatprep.mubr.msk.f32.mxu1 %vm4695_vm4, %v4696_v10 }
 0x1b6   :  { %v3717_v53 = vadd.f32 %v3716_v51, %v3715_v47  ;;  %v3786_v54 = vpop.f32.mrb[15].mxu1  ;;  %4066 = vmatprep.subr.bf16.mxu1 %v4696_v10 }
 0x1b7   :  { %v4998_v58 = vadd.f32 %v3784_v49, %v3714_v45  ;;  %v3787_v59 = vadd.f32 %v3786_v54, %v3785_v50  ;;  %v2746_v49 = vsel %vm2052_vm5, %v2745_v46, %v2741_v30 }
 0x1b8   :  { %4064 = vmatmul.mubr.msk.f32.vlgmr.msra.gmra.mrb[88].mxu1 %vm2054_vm6, %v2746_v49 }
 0x1b9   :  { %v5010_v62 = vadd.f32 %v3787_v59, %v3717_v53  ;;  %4082 = vmatprep.mubr.msk.bf16.mxu1 %vm4695_vm4, %v4696_v10  ;;  %4067 = vmatpush3.bf16.msra.mxu1 %v4379_v21 }
 0x1ba   :  { %v3718_v0 = vpop.f32.mrb[16].mxu0  ;;  %4068 = vmatprep.subr.bf16.mxu1 %v4696_v10 }
 0x1bb   :  { %v3788_v2 = vpop.f32.mrb[16].mxu1  ;;  %v3719_v3 = vpop.f32.mrb[17].mxu0 }
 0x1bc   :  { %v3720_v5 = vadd.f32 %v3719_v3, %v3718_v0  ;;  %v3789_v6 = vpop.f32.mrb[17].mxu1  ;;  %v3721_v8 = vpop.f32.mrb[18].mxu0 }
 0x1bd   :  { %v3790_v12 = vadd.f32 %v3789_v6, %v3788_v2  ;;  %v3791_v13 = vpop.f32.mrb[18].mxu1  ;;  %v3722_v14 = vpop.f32.mrb[19].mxu0 }
 0x1be   :  { %v3723_v16 = vadd.f32 %v3722_v14, %v3721_v8  ;;  %v3792_v17 = vpop.f32.mrb[19].mxu1 }
 0x1bf   :  { %v5030_v19 = vadd.f32 %v3790_v12, %v3720_v5  ;;  %v3793_v20 = vadd.f32 %v3792_v17, %v3791_v13 }
 0x1c1   :  { %v5042_v23 = vadd.f32 %v3793_v20, %v3723_v16 }
 0x1c2   :  { %v3724_v25 = vpop.f32.mrb[20].mxu0 }
 0x1c3   :  { %v3794_v27 = vpop.f32.mrb[20].mxu1  ;;  %v3725_v28 = vpop.f32.mrb[21].mxu0 }
 0x1c4   :  { %v3726_v33 = vadd.f32 %v3725_v28, %v3724_v25  ;;  %v3795_v34 = vpop.f32.mrb[21].mxu1  ;;  %v3727_v37 = vpop.f32.mrb[22].mxu0 }
 0x1c5   :  { %v3796_v40 = vadd.f32 %v3795_v34, %v3794_v27  ;;  %v3797_v41 = vpop.f32.mrb[22].mxu1  ;;  %v3728_v42 = vpop.f32.mrb[23].mxu0 }
 0x1c6   :  { %v3729_v44 = vadd.f32 %v3728_v42, %v3727_v37  ;;  %v3798_v45 = vpop.f32.mrb[23].mxu1  ;;  %v4380_v37 = vld [vmem:[%s5293_s8 + $0x8] sm:$0xff]  }
 0x1c7   :  { %v5062_v47 = vadd.f32 %v3796_v40, %v3726_v33  ;;  %v3799_v48 = vadd.f32 %v3798_v45, %v3797_v41  ;;  %4069 = vmatpush3.bf16.msra.mxu1 %v4380_v37 }
 0x1c8   :  { %4070 = vmatprep.subr.bf16.mxu1 %v4696_v10 }
 0x1c9   :  { %v5074_v50 = vadd.f32 %v3799_v48, %v3729_v44  ;;  %v4381_v44 = vld [vmem:[%s5293_s8 + $0x10] sm:$0xff]  }
 0x1ca   :  { %v3730_v51 = vpop.f32.mrb[24].mxu0 }
 0x1cb   :  { %v3800_v52 = vpop.f32.mrb[24].mxu1  ;;  %v3731_v53 = vpop.f32.mrb[25].mxu0  ;;  %4071 = vmatpush3.bf16.msra.mxu1 %v4381_v44 }
 0x1cc   :  { %v3732_v35 = vadd.f32 %v3731_v53, %v3730_v51  ;;  %v3801_v36 = vpop.f32.mrb[25].mxu1  ;;  %v3733_v54 = vpop.f32.mrb[26].mxu0  ;;  %4072 = vmatprep.subr.bf16.mxu1 %v4696_v10 }
 0x1cd   :  { %v3802_v56 = vadd.f32 %v3801_v36, %v3800_v52  ;;  %v3803_v59 = vpop.f32.mrb[26].mxu1  ;;  %v3734_v60 = vpop.f32.mrb[27].mxu0  ;;  %v4382_v36 = vld [vmem:[%s5293_s8 + $0x18] sm:$0xff]  }
 0x1ce   :  { %v3735_v61 = vadd.f32 %v3734_v60, %v3733_v54  ;;  %v3804_v63 = vpop.f32.mrb[27].mxu1 }
 0x1cf   :  { %v5079_v0 = vadd.f32 %v3802_v56, %v3732_v35  ;;  %v3805_v1 = vadd.f32 %v3804_v63, %v3803_v59  ;;  %4073 = vmatpush3.bf16.msra.mxu1 %v4382_v36 }
 0x1d0   :  { %4074 = vmatprep.subr.bf16.mxu1 %v4696_v10 }
 0x1d1   :  { %v5081_v2 = vadd.f32 %v3805_v1, %v3735_v61  ;;  %v4383_v1 = vld [vmem:[%s5293_s8 + $0x20] sm:$0xff]  }
 0x1d2   :  { %v3736_v3 = vpop.f32.mrb[28].mxu0 }
 0x1d3   :  { %v3806_v4 = vpop.f32.mrb[28].mxu1  ;;  %v3737_v5 = vpop.f32.mrb[29].mxu0  ;;  %4075 = vmatpush3.bf16.msra.mxu1 %v4383_v1 }
 0x1d4   :  { %v3738_v6 = vadd.f32 %v3737_v5, %v3736_v3  ;;  %v3807_v8 = vpop.f32.mrb[29].mxu1  ;;  %v3739_v9 = vpop.f32.mrb[30].mxu0  ;;  %4076 = vmatprep.subr.bf16.mxu1 %v4696_v10 }
 0x1d5   :  { %v3808_v12 = vadd.f32 %v3807_v8, %v3806_v4  ;;  %v3809_v13 = vpop.f32.mrb[30].mxu1  ;;  %v3740_v14 = vpop.f32.mrb[31].mxu0 }
 0x1d6   :  { %v3741_v15 = vadd.f32 %v3740_v14, %v3739_v9  ;;  %v3810_v16 = vpop.f32.mrb[31].mxu1  ;;  %v4384_v14 = vld [vmem:[%s5293_s8 + $0x28] sm:$0xff]  }
 0x1d7   :  { %v5083_v17 = vadd.f32 %v3808_v12, %v3738_v6  ;;  %v3811_v18 = vadd.f32 %v3810_v16, %v3809_v13  ;;  %4077 = vmatpush3.bf16.msra.mxu1 %v4384_v14 }
 0x1d8   :  { %4078 = vmatprep.subr.bf16.mxu1 %v4696_v10 }
 0x1d9   :  { %v5085_v20 = vadd.f32 %v3811_v18, %v3741_v15 }
 0x1da   :  { %v3742_v22 = vpop.f32.mrb[32].mxu0 }
 0x1db   :  { %v3812_v24 = vpop.f32.mrb[32].mxu1  ;;  %v3743_v25 = vpop.f32.mrb[33].mxu0 }
 0x1dc   :  { %v3744_v26 = vadd.f32 %v3743_v25, %v3742_v22  ;;  %v3813_v27 = vpop.f32.mrb[33].mxu1  ;;  %v3745_v28 = vpop.f32.mrb[34].mxu0  ;;  %v4385_v25 = vld [vmem:[%s5293_s8 + $0x30] sm:$0xff]  }
 0x1dd   :  { %v3814_v29 = vadd.f32 %v3813_v27, %v3812_v24  ;;  %v3815_v33 = vpop.f32.mrb[34].mxu1  ;;  %v3746_v34 = vpop.f32.mrb[35].mxu0  ;;  %4079 = vmatpush3.bf16.msra.mxu1 %v4385_v25 }
 0x1de   :  { %v3747_v39 = vadd.f32 %v3746_v34, %v3745_v28  ;;  %v3816_v40 = vpop.f32.mrb[35].mxu1  ;;  %4080 = vmatprep.subr.bf16.mxu1 %v4696_v10 }
 0x1df   :  { %v5094_v41 = vadd.f32 %v3814_v29, %v3744_v26  ;;  %v3817_v42 = vadd.f32 %v3816_v40, %v3815_v33  ;;  %v4386_v40 = vld [vmem:[%s5293_s8 + $0x38] sm:$0xff]  }
 0x1e1   :  { %v5097_v43 = vadd.f32 %v3817_v42, %v3747_v39  ;;  %4081 = vmatpush3.bf16.msra.mxu1 %v4386_v40 }
 0x1e2   :  { %v3834_v45 = vpop.f32.mrb[36].mxu0 }
 0x1e3   :  { %v3835_v46 = vpop.f32.mrb[37].mxu0  ;;  %v3904_v48 = vpop.f32.mrb[36].mxu1 }
 0x1e4   :  { %v3836_v30 = vadd.f32 %v3835_v46, %v3834_v45  ;;  %v3837_v49 = vpop.f32.mrb[38].mxu0  ;;  %v3905_v51 = vpop.f32.mrb[37].mxu1 }
 0x1e5   :  { %v3838_v52 = vpop.f32.mrb[39].mxu0  ;;  %v3906_v53 = vadd.f32 %v3905_v51, %v3904_v48  ;;  %v3907_v35 = vpop.f32.mrb[38].mxu1 }
 0x1e6   :  { %v1569_v54 = vadd.f32 %v3836_v30, %v4928_v55  ;;  %v3839_v56 = vadd.f32 %v3838_v52, %v3837_v49  ;;  %v3908_v59 = vpop.f32.mrb[39].mxu1 }
 0x1e7   :  { %v3909_v60 = vadd.f32 %v3908_v59, %v3907_v35 }
 0x1e8   :  { %v1572_v61 = vadd.f32 %v3839_v56, %v4930_v57  ;;  %v5108_v63 = vadd.f32 %v3906_v53, %v1569_v54 }
 0x1ea   :  { %v3840_v3 = vpop.f32.mrb[40].mxu0  ;;  %v5114_v4 = vadd.f32 %v3909_v60, %v1572_v61 }
 0x1eb   :  { %v3841_v5 = vpop.f32.mrb[41].mxu0  ;;  %v3910_v6 = vpop.f32.mrb[40].mxu1 }
 0x1ec   :  { %v3842_v55 = vadd.f32 %v3841_v5, %v3840_v3  ;;  %v3843_v8 = vpop.f32.mrb[42].mxu0  ;;  %v3911_v9 = vpop.f32.mrb[41].mxu1 }
 0x1ed   :  { %v3844_v57 = vpop.f32.mrb[43].mxu0  ;;  %v3912_v12 = vadd.f32 %v3911_v9, %v3910_v6  ;;  %v3913_v13 = vpop.f32.mrb[42].mxu1 }
 0x1ee   :  { %v1577_v15 = vadd.f32 %v3842_v55, %v4935_v7  ;;  %v3845_v16 = vadd.f32 %v3844_v57, %v3843_v8  ;;  %v3914_v18 = vpop.f32.mrb[43].mxu1 }
 0x1ef   :  { %v3915_v21 = vadd.f32 %v3914_v18, %v3913_v13 }
 0x1f0   :  { %v1580_v22 = vadd.f32 %v3845_v16, %v4943_v11  ;;  %v5122_v24 = vadd.f32 %v3912_v12, %v1577_v15 }
 0x1f2   :  { %v3846_v26 = vpop.f32.mrb[44].mxu0  ;;  %v5128_v27 = vadd.f32 %v3915_v21, %v1580_v22 }
 0x1f3   :  { %v3847_v28 = vpop.f32.mrb[45].mxu0  ;;  %v3916_v29 = vpop.f32.mrb[44].mxu1 }
 0x1f4   :  { %v3848_v7 = vadd.f32 %v3847_v28, %v3846_v26  ;;  %v3849_v33 = vpop.f32.mrb[46].mxu0  ;;  %v3917_v34 = vpop.f32.mrb[45].mxu1 }
 0x1f5   :  { %v3850_v11 = vpop.f32.mrb[47].mxu0  ;;  %v3918_v37 = vadd.f32 %v3917_v34, %v3916_v29  ;;  %v3919_v39 = vpop.f32.mrb[46].mxu1 }
 0x1f6   :  { %v1585_v42 = vadd.f32 %v3848_v7, %v4966_v32  ;;  %v3851_v44 = vadd.f32 %v3850_v11, %v3849_v33  ;;  %v3920_v45 = vpop.f32.mrb[47].mxu1 }
 0x1f7   :  { %v3921_v46 = vadd.f32 %v3920_v45, %v3919_v39 }
 0x1f8   :  { %v1588_v48 = vadd.f32 %v3851_v44, %v4978_v38  ;;  %v5136_v30 = vadd.f32 %v3918_v37, %v1585_v42 }
 0x1fa   :  { %v3852_v49 = vpop.f32.mrb[48].mxu0  ;;  %v5138_v51 = vadd.f32 %v3921_v46, %v1588_v48  ;;  %v4387_v48 = vld [vmem:[#allocation14] sm:$0xff]  }
 0x1fb   :  { %v3853_v52 = vpop.f32.mrb[49].mxu0  ;;  %v3922_v53 = vpop.f32.mrb[48].mxu1  ;;  %4087 = vmatpush3.bf16.msra.mxu0 %v4387_v48 }
 0x1fc   :  { %v3854_v35 = vadd.f32 %v3853_v52, %v3852_v49  ;;  %v3855_v36 = vpop.f32.mrb[50].mxu0  ;;  %v3923_v54 = vpop.f32.mrb[49].mxu1  ;;  %4088 = vmatprep.subr.bf16.mxu0 %v4696_v10 }
 0x1fd   :  { %v3856_v56 = vpop.f32.mrb[51].mxu0  ;;  %v3924_v59 = vadd.f32 %v3923_v54, %v3922_v53  ;;  %v3925_v60 = vpop.f32.mrb[50].mxu1 }
 0x1fe   :  { %v1593_v32 = vadd.f32 %v3854_v35, %v4998_v58  ;;  %v3857_v61 = vadd.f32 %v3856_v56, %v3855_v36  ;;  %v3926_v1 = vpop.f32.mrb[51].mxu1 }
 0x1ff   :  { %v3927_v3 = vadd.f32 %v3926_v1, %v3925_v60 }
 0x200   :  { %v1596_v38 = vadd.f32 %v3857_v61, %v5010_v62  ;;  %v5142_v5 = vadd.f32 %v3924_v59, %v1593_v32 }
 0x202   :  { %v3858_v6 = vpop.f32.mrb[52].mxu0  ;;  %v5144_v55 = vadd.f32 %v3927_v3, %v1596_v38 }
 0x203   :  { %v3859_v8 = vpop.f32.mrb[53].mxu0  ;;  %v3928_v9 = vpop.f32.mrb[52].mxu1 }
 0x204   :  { %v3860_v57 = vadd.f32 %v3859_v8, %v3858_v6  ;;  %v3861_v12 = vpop.f32.mrb[54].mxu0  ;;  %v3929_v13 = vpop.f32.mrb[53].mxu1 }
 0x205   :  { %v3862_v14 = vpop.f32.mrb[55].mxu0  ;;  %v3930_v15 = vadd.f32 %v3929_v13, %v3928_v9  ;;  %v3931_v16 = vpop.f32.mrb[54].mxu1 }
 0x206   :  { %v1601_v58 = vadd.f32 %v3860_v57, %v5030_v19  ;;  %v3863_v18 = vadd.f32 %v3862_v14, %v3861_v12  ;;  %v3932_v21 = vpop.f32.mrb[55].mxu1 }
 0x207   :  { %v3933_v22 = vadd.f32 %v3932_v21, %v3931_v16  ;;  %v1882_v21 = vlaneseq }
 0x208   :  { %v1604_v62 = vadd.f32 %v3863_v18, %v5042_v23  ;;  %v5148_v25 = vadd.f32 %v3930_v15, %v1601_v58  ;;  %v4697_v18 = vmov 1966171168  }
 0x20a   :  { %v3864_v26 = vpop.f32.mrb[56].mxu0  ;;  %v5150_v28 = vadd.f32 %v3933_v22, %v1604_v62 }
 0x20b   :  { %v3865_v29 = vpop.f32.mrb[57].mxu0  ;;  %v3934_v7 = vpop.f32.mrb[56].mxu1 }
 0x20c   :  { %v3866_v33 = vadd.f32 %v3865_v29, %v3864_v26  ;;  %v3867_v34 = vpop.f32.mrb[58].mxu0  ;;  %v3935_v11 = vpop.f32.mrb[57].mxu1 }
 0x20d   :  { %v3868_v37 = vpop.f32.mrb[59].mxu0  ;;  %v3936_v39 = vadd.f32 %v3935_v11, %v3934_v7  ;;  %v3937_v40 = vpop.f32.mrb[58].mxu1  ;;  %v5169_v11 = vshrl.u32 %v1882_v21, 7 }
 0x20e   :  { %v1609_v19 = vadd.f32 %v3866_v33, %v5062_v47  ;;  %v3869_v42 = vadd.f32 %v3868_v37, %v3867_v34  ;;  %v3938_v44 = vpop.f32.mrb[59].mxu1  ;;  %v4388_v33 = vld [vmem:[#allocation14 + $0x8] sm:$0xff]  }
 0x20f   :  { %v3939_v45 = vadd.f32 %v3938_v44, %v3937_v40  ;;  %4089 = vmatpush3.bf16.msra.mxu0 %v4388_v33 }
 0x210   :  { %v1612_v23 = vadd.f32 %v3869_v42, %v5074_v50  ;;  %v5154_v46 = vadd.f32 %v3936_v39, %v1609_v19  ;;  %4090 = vmatprep.subr.bf16.mxu0 %v4696_v10 }
 0x212   :  { %v3870_v49 = vpop.f32.mrb[60].mxu0  ;;  %v5156_v52 = vadd.f32 %v3939_v45, %v1612_v23 }
 0x213   :  { %v3871_v53 = vpop.f32.mrb[61].mxu0  ;;  %v3940_v35 = vpop.f32.mrb[60].mxu1 }
 0x214   :  { %v3872_v36 = vadd.f32 %v3871_v53, %v3870_v49  ;;  %v3873_v54 = vpop.f32.mrb[62].mxu0  ;;  %v3941_v56 = vpop.f32.mrb[61].mxu1 }
 0x215   :  { %v3874_v47 = vpop.f32.mrb[63].mxu0  ;;  %v3942_v59 = vadd.f32 %v3941_v56, %v3940_v35  ;;  %v3943_v60 = vpop.f32.mrb[62].mxu1 }
 0x216   :  { %v1617_v32 = vadd.f32 %v3872_v36, %v5079_v0  ;;  %v3875_v50 = vadd.f32 %v3874_v47, %v3873_v54  ;;  %v3944_v61 = vpop.f32.mrb[63].mxu1  ;;  %v1880_v0 = vunpack.c.l.s4 %v4697_v18  ;;  %v5181_v36 = vld [vmem:[%s5288_s3] sm:$0xff] }
 0x217   :  { %v3945_v1 = vadd.f32 %v3944_v61, %v3943_v60  ;;  %v4389_v54 = vld [vmem:[#allocation14 + $0x10] sm:$0xff]   ;;  %v4390_v60 = vld [vmem:[#allocation14 + $0x18] sm:$0xff]  }
 0x218   :  { %v1620_v3 = vadd.f32 %v3875_v50, %v5081_v2  ;;  %v5161_v38 = vadd.f32 %v3942_v59, %v1617_v32  ;;  %v1881_v34 = vunpack.c.0.s8 %v1880_v0  ;;  %4091 = vmatpush3.bf16.msra.mxu0 %v4389_v54 }
 0x219   :  { %4092 = vmatprep.subr.bf16.mxu0 %v4696_v10 }
 0x21a   :  { %v3876_v6 = vpop.f32.mrb[64].mxu0  ;;  %v5163_v8 = vadd.f32 %v3945_v1, %v1620_v3  ;;  %v5175_v48 = vsub.s32 %v1881_v34, %v5169_v11 }
 0x21b   :  { %v3877_v9 = vpop.f32.mrb[65].mxu0  ;;  %v3946_v57 = vpop.f32.mrb[64].mxu1 }
 0x21c   :  { %v3878_v12 = vadd.f32 %v3877_v9, %v3876_v6  ;;  %v3879_v13 = vpop.f32.mrb[66].mxu0  ;;  %v3947_v14 = vpop.f32.mrb[65].mxu1  ;;  %v1885_v32 = vrot.slane %v5181_v36, %v5175_v48  ;;  %4093 = vmatpush3.bf16.msra.mxu0 %v4390_v60  ;;  %v4391_v9 = vld [vmem:[#allocation14 + $0x20] sm:$0xff]  }
 0x21d   :  { %v3880_v15 = vpop.f32.mrb[67].mxu0  ;;  %v3948_v16 = vadd.f32 %v3947_v14, %v3946_v57  ;;  %v3949_v58 = vpop.f32.mrb[66].mxu1  ;;  %v5194_v57 = vsub.s32 0, %v5169_v11  ;;  %4094 = vmatprep.subr.bf16.mxu0 %v4696_v10  ;;  %v5198_v14 = vld [vmem:[#allocation7] ss:$0 sm:$0xff] }
 0x21e   :  { %v1625_v22 = vadd.f32 %v3878_v12, %v5083_v17  ;;  %v3881_v62 = vadd.f32 %v3880_v15, %v3879_v13  ;;  %v3950_v2 = vpop.f32.mrb[67].mxu1  ;;  %v1893_v3 = vcombine.high %v1885_v32, %v1885_v32 }
 0x21f   :  { %v3951_v26 = vadd.f32 %v3950_v2, %v3949_v58  ;;  %v4393_v2 = vld [vmem:[#allocation14 + $0x30] sm:$0xff]  }
 0x220   :  { %v1628_v29 = vadd.f32 %v3881_v62, %v5085_v20  ;;  %v5167_v7 = vadd.f32 %v3948_v16, %v1625_v22  ;;  %v1915_v15 = vrot.slane %v1893_v3, %v5175_v48  ;;  %4095 = vmatpush3.bf16.msra.mxu0 %v4391_v9 }
 0x221   :  { %4096 = vmatprep.subr.bf16.mxu0 %v4696_v10 }
 0x222   :  { %v3882_v37 = vpop.f32.mrb[68].mxu0  ;;  %v5171_v39 = vadd.f32 %v3951_v26, %v1628_v29  ;;  %v1948_v21 = vrot.slane %v1915_v15, %v5194_v57 }
 0x223   :  { %v3883_v40 = vpop.f32.mrb[69].mxu0  ;;  %v3952_v19 = vpop.f32.mrb[68].mxu1 }
 0x224   :  { %v3884_v17 = vadd.f32 %v3883_v40, %v3882_v37  ;;  %v3885_v42 = vpop.f32.mrb[70].mxu0  ;;  %v3953_v44 = vpop.f32.mrb[69].mxu1 }
 0x225   :  { %v3886_v45 = vpop.f32.mrb[71].mxu0  ;;  %v3954_v23 = vadd.f32 %v3953_v44, %v3952_v19  ;;  %v3955_v20 = vpop.f32.mrb[70].mxu1 }
 0x226   :  { %v1633_v49 = vadd.f32 %v3884_v17, %v5094_v41  ;;  %v3887_v53 = vadd.f32 %v3886_v45, %v3885_v42  ;;  %v3956_v35 = vpop.f32.mrb[71].mxu1 }
 0x227   :  { %v3957_v56 = vadd.f32 %v3956_v35, %v3955_v20 }
 0x228   :  { %v1636_v47 = vadd.f32 %v3887_v53, %v5097_v43  ;;  %v5184_v59 = vadd.f32 %v3954_v23, %v1633_v49  ;;  %v1901_v43 = vrot.slane %v1885_v32, %v5175_v48 }
 0x22a   :  { %v1778_v41 = vpop.f32.mrb[72].mxu0  ;;  %v5189_v50 = vadd.f32 %v3957_v56, %v1636_v47  ;;  %v1944_v58 = vrot.slane %v1901_v43, %v5194_v57  ;;  %v1923_v37 = vcombine.high %v1901_v43, %v1901_v43 }
 0x22b   :  { %v1779_v61 = vadd.f32 %v1778_v41, %v5108_v63  ;;  %v1780_v1 = vpop.f32.mrb[73].mxu0  ;;  %v4392_v63 = vld [vmem:[#allocation14 + $0x28] sm:$0xff]   ;;  %v1878_v41 = vcombine.high %v5181_v36, %v5181_v36 }
 0x22c   :  { %v1781_v6 = vpop.f32.mrb[74].mxu0  ;;  %4097 = vmatpush3.bf16.msra.mxu0 %v4392_v63  ;;  %v1952_v23 = vrot.slane %v1923_v37, %v5194_v57  ;;  %v1925_v1 = vcombine.high %v1915_v15, %v1915_v15 }
 0x22d   :  { %v1782_v12 = vadd.f32 %v1781_v6, %v5114_v4  ;;  %v1783_v13 = vpop.f32.mrb[75].mxu0  ;;  %v1856_v16 = vadd.f32 %v5198_v14, %v1779_v61  ;;  %4098 = vmatprep.subr.bf16.mxu0 %v4696_v10 }
 0x22e   :  { %v1956_v63 = vrot.slane %v1925_v1, %v5194_v57 }
 0x22f   :  { %v1857_v0 = vadd.f32 %v5198_v14, %v1782_v12  ;;  %v1986_v26 = vadd.f32 %v1944_v58, %v1856_v16 }
 0x230   :  { %4099 = vmatpush3.bf16.msra.mxu0 %v4393_v2 }
 0x231   :  { %v1987_v40 = vadd.f32 %v1944_v58, %v1857_v0  ;;  %4100 = vmatprep.subr.bf16.mxu0 %v4696_v10 }
 0x232   :  { %v1786_v18 = vpop.f32.mrb[76].mxu0 }
 0x233   :  { %v1787_v4 = vadd.f32 %v1786_v18, %v5122_v24  ;;  %v1788_v22 = vpop.f32.mrb[77].mxu0  ;;  %v2004_v24 = vmax.f32 %v1986_v26, 0.0  ;;  %v2005_v20 = vmax.f32 %v1987_v40, 0.0 }
 0x234   :  { %v1789_v62 = vpop.f32.mrb[78].mxu0 }
 0x235   :  { %v1858_v29 = vadd.f32 %v5198_v14, %v1787_v4  ;;  %v1790_v33 = vadd.f32 %v1789_v62, %v5128_v27  ;;  %v1791_v34 = vpop.f32.mrb[79].mxu0 }
 0x237   :  { %v1988_v19 = vadd.f32 %v1948_v21, %v1858_v29  ;;  %v1859_v17 = vadd.f32 %v5198_v14, %v1790_v33 }
 0x239   :  { %v2006_v42 = vmax.f32 %v1988_v19, 0.0  ;;  %v1989_v44 = vadd.f32 %v1948_v21, %v1859_v17 }
 0x23a   :  { %v1794_v45 = vpop.f32.mrb[80].mxu0 }
 0x23b   :  { %v2022_v49 = vadd.f32 %v2006_v42, %v2004_v24  ;;  %v2007_v27 = vmax.f32 %v1989_v44, 0.0  ;;  %v1795_v53 = vadd.f32 %v1794_v45, %v5136_v30  ;;  %v1796_v35 = vpop.f32.mrb[81].mxu0  ;;  %v1892_v30 = vrot.slane %v1878_v41, %v5175_v48 }
 0x23c   :  { %v1797_v54 = vpop.f32.mrb[82].mxu0 }
 0x23d   :  { %v2030_v56 = vadd.f32 %v2007_v27, %v2005_v20  ;;  %v1860_v47 = vadd.f32 %v5198_v14, %v1795_v53  ;;  %v1798_v60 = vadd.f32 %v1797_v54, %v5138_v51  ;;  %v1799_v32 = vpop.f32.mrb[83].mxu0  ;;  %v1908_v15 = vrot.slane %v1892_v30, %v5175_v48 }
 0x23e   :  { %v1894_v37 = vcombine.high %v1892_v30, %v1892_v30 }
 0x23f   :  { %v1990_v10 = vadd.f32 %v1952_v23, %v1860_v47  ;;  %v1861_v61 = vadd.f32 %v5198_v14, %v1798_v60 }
 0x240   :  { %v1922_v45 = vrot.slane %v1894_v37, %v5175_v48 }
 0x241   :  { %v2008_v3 = vmax.f32 %v1990_v10, 0.0  ;;  %v1991_v6 = vadd.f32 %v1952_v23, %v1861_v61  ;;  %v1924_v61 = vcombine.high %v1908_v15, %v1908_v15 }
 0x242   :  { %v1802_v9 = vpop.f32.mrb[84].mxu0  ;;  %v1964_v35 = vrot.slane %v1922_v45, %v5194_v57 }
 0x243   :  { %v2023_v43 = vadd.f32 %v2022_v49, %v2008_v3  ;;  %v2009_v12 = vmax.f32 %v1991_v6, 0.0  ;;  %v1803_v13 = vadd.f32 %v1802_v9, %v5142_v5  ;;  %v1804_v51 = vpop.f32.mrb[85].mxu0  ;;  %v1960_v5 = vrot.slane %v1908_v15, %v5194_v57 }
 0x244   :  { %v1805_v16 = vpop.f32.mrb[86].mxu0 }
 0x245   :  { %v2031_v58 = vadd.f32 %v2030_v56, %v2009_v12  ;;  %v1862_v36 = vadd.f32 %v5198_v14, %v1803_v13  ;;  %v1806_v18 = vadd.f32 %v1805_v16, %v5144_v55  ;;  %v1807_v0 = vpop.f32.mrb[87].mxu0 }
 0x247   :  { %v1992_v4 = vadd.f32 %v1956_v63, %v1862_v36  ;;  %v1863_v21 = vadd.f32 %v5198_v14, %v1806_v18  ;;  %v1926_v18 = vcombine.high %v1922_v45, %v1922_v45 }
 0x249   :  { %v2010_v22 = vmax.f32 %v1992_v4, 0.0  ;;  %v1993_v62 = vadd.f32 %v1956_v63, %v1863_v21 }
 0x24a   :  { %v1810_v2 = vpop.f32.mrb[88].mxu0 }
 0x24b   :  { %v2024_v26 = vadd.f32 %v2023_v43, %v2010_v22  ;;  %v2011_v29 = vmax.f32 %v1993_v62, 0.0  ;;  %v1811_v33 = vadd.f32 %v1810_v2, %v5148_v25  ;;  %v1812_v34 = vpop.f32.mrb[89].mxu0  ;;  %v1968_v43 = vrot.slane %v1924_v61, %v5194_v57 }
 0x24c   :  { %v1813_v40 = vpop.f32.mrb[90].mxu0  ;;  %v1972_v62 = vrot.slane %v1926_v18, %v5194_v57 }
 0x24d   :  { %v2032_v19 = vadd.f32 %v2031_v58, %v2011_v29  ;;  %v1864_v55 = vadd.f32 %v5198_v14, %v1811_v33  ;;  %v1814_v17 = vadd.f32 %v1813_v40, %v5150_v28  ;;  %v1815_v24 = vpop.f32.mrb[91].mxu0 }
 0x24f   :  { %v1994_v42 = vadd.f32 %v1960_v5, %v1864_v55  ;;  %v1865_v44 = vadd.f32 %v5198_v14, %v1814_v17 }
 0x251   :  { %v2012_v23 = vmax.f32 %v1994_v42, 0.0  ;;  %v1995_v20 = vadd.f32 %v1960_v5, %v1865_v44 }
 0x252   :  { %v1818_v49 = vpop.f32.mrb[92].mxu0 }
 0x253   :  { %v2025_v27 = vadd.f32 %v2024_v26, %v2012_v23  ;;  %v2013_v53 = vmax.f32 %v1995_v20, 0.0  ;;  %v1819_v25 = vadd.f32 %v1818_v49, %v5154_v46  ;;  %v1820_v54 = vpop.f32.mrb[93].mxu0 }
 0x254   :  { %v1821_v56 = vpop.f32.mrb[94].mxu0 }
 0x255   :  { %v2033_v47 = vadd.f32 %v2032_v19, %v2013_v53  ;;  %v1866_v28 = vadd.f32 %v5198_v14, %v1819_v25  ;;  %v1822_v60 = vadd.f32 %v1821_v56, %v5156_v52  ;;  %v1823_v32 = vpop.f32.mrb[95].mxu0 }
 0x257   :  { %v1996_v41 = vadd.f32 %v1964_v35, %v1866_v28  ;;  %v1867_v10 = vadd.f32 %v5198_v14, %v1822_v60 }
 0x259   :  { %v2014_v1 = vmax.f32 %v1996_v41, 0.0  ;;  %v1997_v3 = vadd.f32 %v1964_v35, %v1867_v10  ;;  %v2127_v41 = vpop.f32.mrb[72].mxu1  ;;  %v3603_v10 = vld [vmem:[#allocation11] ss:$0 sm:$0xff] }
 0x25a   :  { %v1826_v6 = vpop.f32.mrb[96].mxu0 }
 0x25b   :  { %v2026_v9 = vadd.f32 %v2025_v27, %v2014_v1  ;;  %v2015_v30 = vmax.f32 %v1997_v3, 0.0  ;;  %v1827_v46 = vadd.f32 %v1826_v6, %v5161_v38  ;;  %v1828_v12 = vpop.f32.mrb[97].mxu0  ;;  %v4009_v1 = vpop.f32.mrb[73].mxu1  ;;  %v3606_v6 = vld [vmem:[#allocation11 + $0x1] ss:$0 sm:$0xff] }
 0x25c   :  { %v1829_v13 = vpop.f32.mrb[98].mxu0  ;;  %v3609_v12 = vld [vmem:[#allocation11 + $0x2] ss:$0 sm:$0xff]  ;;  %v4394_v1 = vld [vmem:[#allocation14 + $0x38] sm:$0xff]  }
 0x25d   :  { %v2034_v63 = vadd.f32 %v2033_v47, %v2015_v30  ;;  %v1868_v51 = vadd.f32 %v5198_v14, %v1827_v46  ;;  %v1830_v52 = vadd.f32 %v1829_v13, %v5163_v8  ;;  %v1831_v16 = vpop.f32.mrb[99].mxu0  ;;  %v3599_v8 = vld.sshfl [vmem:[%s5288_s3 + $0x8] sm:$0x1 pattern:$0x75316420]  ;;  %4101 = vmatpush3.bf16.msra.mxu0 %v4394_v1 }
 0x25e   :  { %v1940_v19 = vrot.slane %v3599_v8, %v5175_v48 }
 0x25f   :  { %v1998_v58 = vadd.f32 %v1968_v43, %v1868_v51  ;;  %v1869_v36 = vadd.f32 %v5198_v14, %v1830_v52 }
 0x260   :  { %v1976_v45 = vrot.slane %v1940_v19, %v5194_v57 }
 0x261   :  { %v2016_v0 = vmax.f32 %v1998_v58, 0.0  ;;  %v1999_v15 = vadd.f32 %v1968_v43, %v1869_v36  ;;  %v3612_v36 = vld [vmem:[#allocation11 + $0x3] ss:$0 sm:$0xff] }
 0x262   :  { %v1834_v4 = vpop.f32.mrb[100].mxu0 }
 0x263   :  { %v2027_v21 = vadd.f32 %v2026_v9, %v2016_v0  ;;  %v2017_v22 = vmax.f32 %v1999_v15, 0.0  ;;  %v1835_v38 = vadd.f32 %v1834_v4, %v5167_v7  ;;  %v1836_v2 = vpop.f32.mrb[101].mxu0 }
 0x264   :  { %v1837_v5 = vpop.f32.mrb[102].mxu0 }
 0x265   :  { %v2035_v26 = vadd.f32 %v2034_v63, %v2017_v22  ;;  %v1870_v29 = vadd.f32 %v5198_v14, %v1835_v38  ;;  %v1838_v33 = vadd.f32 %v1837_v5, %v5171_v39  ;;  %v1839_v34 = vpop.f32.mrb[103].mxu0  ;;  %v3615_v38 = vld [vmem:[#allocation11 + $0x4] ss:$0 sm:$0xff] }
 0x267   :  { %v2000_v37 = vadd.f32 %v1972_v62, %v1870_v29  ;;  %v1871_v40 = vadd.f32 %v5198_v14, %v1838_v33  ;;  %v3618_v33 = vld [vmem:[#allocation11 + $0x5] ss:$0 sm:$0xff] }
 0x269   :  { %v2018_v7 = vmax.f32 %v2000_v37, 0.0  ;;  %v2001_v55 = vadd.f32 %v1972_v62, %v1871_v40 }
 0x26a   :  { %v1842_v17 = vpop.f32.mrb[104].mxu0 }
 0x26b   :  { %v2028_v24 = vadd.f32 %v2027_v21, %v2018_v7  ;;  %v2019_v42 = vmax.f32 %v2001_v55, 0.0  ;;  %v1843_v44 = vadd.f32 %v1842_v17, %v5184_v59  ;;  %v1844_v23 = vpop.f32.mrb[105].mxu0  ;;  %v3600_v59 = vld [vmem:[#allocation10] ss:$0 sm:$0xff]  ;;  %v3621_v17 = vld [vmem:[#allocation11 + $0x6] ss:$0 sm:$0xff] }
 0x26c   :  { %v1845_v20 = vpop.f32.mrb[106].mxu0  ;;  %v2128_v61 = vadd.f32 %v3600_v59, %v2127_v41 }
 0x26d   :  { %v2036_v49 = vadd.f32 %v2035_v26, %v2019_v42  ;;  %v1872_v39 = vadd.f32 %v5198_v14, %v1843_v44  ;;  %v1846_v27 = vadd.f32 %v1845_v20, %v5189_v50  ;;  %v1847_v53 = vpop.f32.mrb[107].mxu0  ;;  %v2213_v50 = vpop.f32.mrb[74].mxu1 }
 0x26e   :  { %v2136_v3 = vadd.f32 %v3603_v10, %v2128_v61  ;;  %v2214_v9 = vadd.f32 %v3600_v59, %v2213_v50  ;;  %v4016_v30 = vpop.f32.mrb[75].mxu1  ;;  %v4397_v50 = vld [vmem:[#allocation16 + $0x4] ss:$16 sps:$4 sm:$0xff]  }
 0x26f   :  { %v2002_v25 = vadd.f32 %v1976_v45, %v1872_v39  ;;  %v1873_v35 = vadd.f32 %v5198_v14, %v1846_v27  ;;  %v2299_v43 = vpop.f32.mrb[76].mxu1  ;;  %3309 = vmatprep.subr.bf16.mxu1 %v4397_v50  ;;  %v4401_v30 = vld [vmem:[#allocation16 + $0x20] ss:$16 sps:$4 sm:$0xff]  }
 0x270   :  { %v2137_v14 = vmax.f32 %v2136_v3, 0.0  ;;  %v2222_v46 = vadd.f32 %v3606_v6, %v2214_v9  ;;  %v2300_v63 = vadd.f32 %v3600_v59, %v2299_v43  ;;  %v4023_v51 = vpop.f32.mrb[77].mxu1  ;;  %v4395_v3 = vld [vmem:[#allocation16] ss:$16 sps:$4 sm:$0xff]   ;;  %v4400_v6 = vld [vmem:[#allocation16 + $0xc] ss:$16 sps:$4 sm:$0xff]  }
 0x271   :  { %v2020_v54 = vmax.f32 %v2002_v25, 0.0  ;;  %v2003_v56 = vadd.f32 %v1976_v45, %v1873_v35  ;;  %v2385_v58 = vpop.f32.mrb[78].mxu1  ;;  %v4403_v9 = vld [vmem:[#allocation16 + $0x24] ss:$16 sps:$4 sm:$0xff]   ;;  %3352 = vmatprep.subr.bf16.mxu0 %v4400_v6  ;;  %v4413_v43 = vld [vmem:[#allocation16 + $0x60] ss:$16 sps:$4 sm:$0xff]  }
 0x272   :  { %v2223_v13 = vmax.f32 %v2222_v46, 0.0  ;;  %v2308_v16 = vadd.f32 %v3609_v12, %v2300_v63  ;;  %v2386_v0 = vadd.f32 %v3600_v59, %v2385_v58  ;;  %v4030_v15 = vpop.f32.mrb[79].mxu1  ;;  %v4407_v46 = vld [vmem:[#allocation16 + $0x40] ss:$16 sps:$4 sm:$0xff]   ;;  %v4421_v12 = vld [vmem:[#allocation16 + $0x84] ss:$16 sps:$4 sm:$0xff]  }
 0x273   :  { %v2029_v47 = vadd.f32 %v2028_v24, %v2020_v54  ;;  %v2021_v28 = vmax.f32 %v2003_v56, 0.0  ;;  %v3627_v56 = vld [vmem:[#allocation11 + $0x8] ss:$0 sm:$0xff]  ;;  %v4425_v51 = vld [vmem:[#allocation16 + $0xa0] ss:$16 sps:$4 sm:$0xff]   ;;  %v3135_v6 = vsub.s32 1, %v5169_v11 }
 0x274   :  { %v2224_v52 = vadd.f32 %v2223_v13, %v2137_v14  ;;  %v2309_v18 = vmax.f32 %v2308_v16, 0.0  ;;  %v2394_v21 = vadd.f32 %v3612_v36, %v2386_v0  ;;  %v4409_v14 = vld [vmem:[#allocation16 + $0x44] ss:$16 sps:$4 sm:$0xff]   ;;  %v4419_v13 = vld [vmem:[#allocation16 + $0x80] ss:$16 sps:$4 sm:$0xff]  }
 0x275   :  { %v2037_v60 = vadd.f32 %v2036_v49, %v2021_v28  ;;  %v3624_v49 = vld [vmem:[#allocation11 + $0x7] ss:$0 sm:$0xff]  ;;  %v3628_v58 = vld [vmem:[#allocation13] ss:$0 sm:$0xff] }
 0x276   :  { %v2310_v4 = vadd.f32 %v2309_v18, %v2224_v52  ;;  %v2395_v62 = vmax.f32 %v2394_v21, 0.0  ;;  %v4427_v63 = vld [vmem:[#allocation16 + $0xa4] ss:$16 sps:$4 sm:$0xff]  }
 0x277   :  { %v2827_v32 = vpack.c.bf16 %v2037_v60, %v2029_v47  ;;  %v3127_v50 = vld [vmem:[%s5298_s13] sm:$0xf] }
 0x278   :  { %v2396_v8 = vadd.f32 %v2395_v62, %v2310_v4 }
 0x279   :  { %4083 = vmatmul.mubr.bf16.vlgmr.msra.gmra.mrb[92].mxu1 %v2827_v32 }
 0x27a   :  { %3341 = vmatprep.mubr.bf16.mxu1 %v4692_v31  ;;  %3310 = vmatpush1.bf16.msra.mxu1 %v4395_v3  ;;  %v3139_v3 = vsub.s32 2, %v5169_v11 }
 0x27b   :  { %v2471_v22 = vpop.f32.mrb[80].mxu1  ;;  %3311 = vmatprep.subr.bf16.mxu1 %v4403_v9  ;;  %v3143_v9 = vsub.s32 3, %v5169_v11 }
 0x27c   :  { %v2472_v2 = vadd.f32 %v3600_v59, %v2471_v22  ;;  %v4037_v5 = vpop.f32.mrb[81].mxu1 }
 0x27e   :  { %v2480_v26 = vadd.f32 %v3615_v38, %v2472_v2  ;;  %3312 = vmatpush1.bf16.msra.mxu1 %v4401_v30  ;;  %v3132_v30 = vrot.slane %v3127_v50, %v5194_v57 }
 0x27f   :  { %v2557_v29 = vpop.f32.mrb[82].mxu1  ;;  %3313 = vmatprep.subr.bf16.mxu1 %v4409_v14  ;;  %v3140_v14 = vrot.slane %v3127_v50, %v3139_v3 }
 0x280   :  { %v2481_v34 = vmax.f32 %v2480_v26, 0.0  ;;  %v2558_v37 = vadd.f32 %v3600_v59, %v2557_v29  ;;  %v4044_v40 = vpop.f32.mrb[83].mxu1 }
 0x282   :  { %v2482_v19 = vadd.f32 %v2481_v34, %v2396_v8  ;;  %v2566_v7 = vadd.f32 %v3618_v33, %v2558_v37  ;;  %3314 = vmatpush1.bf16.msra.mxu1 %v4407_v46  ;;  %v4398_v37 = vld [vmem:[#allocation16 + $0x8] ss:$16 sps:$4 sm:$0xff]   ;;  %v3136_v46 = vrot.slane %v3127_v50, %v3135_v6 }
 0x283   :  { %v2643_v55 = vpop.f32.mrb[84].mxu1 }
 0x284   :  { %v2567_v24 = vmax.f32 %v2566_v7, 0.0  ;;  %v2644_v42 = vadd.f32 %v3600_v59, %v2643_v55  ;;  %v4051_v44 = vpop.f32.mrb[85].mxu1  ;;  %v4404_v7 = vld [vmem:[#allocation16 + $0x28] ss:$16 sps:$4 sm:$0xff]  }
 0x285   :  { %v4410_v55 = vld [vmem:[#allocation16 + $0x48] ss:$16 sps:$4 sm:$0xff]  }
 0x286   :  { %v2568_v45 = vadd.f32 %v2567_v24, %v2482_v19  ;;  %v2652_v23 = vadd.f32 %v3621_v17, %v2644_v42  ;;  %v4406_v19 = vld [vmem:[#allocation16 + $0x2c] ss:$16 sps:$4 sm:$0xff]   ;;  %v4416_v24 = vld [vmem:[#allocation16 + $0x68] ss:$16 sps:$4 sm:$0xff]  }
 0x287   :  { %v2729_v20 = vpop.f32.mrb[86].mxu1  ;;  %v4418_v17 = vld [vmem:[#allocation16 + $0x6c] ss:$16 sps:$4 sm:$0xff]   ;;  %v4422_v44 = vld [vmem:[#allocation16 + $0x88] ss:$16 sps:$4 sm:$0xff]  }
 0x288   :  { %v2653_v39 = vmax.f32 %v2652_v23, 0.0  ;;  %v2730_v27 = vadd.f32 %v3600_v59, %v2729_v20  ;;  %v4058_v53 = vpop.f32.mrb[87].mxu1  ;;  %v4424_v42 = vld [vmem:[#allocation16 + $0x8c] ss:$16 sps:$4 sm:$0xff]   ;;  %v4428_v23 = vld [vmem:[#allocation16 + $0xa8] ss:$16 sps:$4 sm:$0xff]  }
 0x289   :  { %v4433_v20 = vld [vmem:[#allocation16 + $0xc4] ss:$16 sps:$4 sm:$0xff]   ;;  %v4442_v53 = vld [vmem:[#allocation16 + $0xec] ss:$16 sps:$4 sm:$0xff]  }
 0x28a   :  { %v2654_v25 = vadd.f32 %v2653_v39, %v2568_v45  ;;  %v2738_v35 = vadd.f32 %v3624_v49, %v2730_v27  ;;  %v4430_v45 = vld [vmem:[#allocation16 + $0xac] ss:$16 sps:$4 sm:$0xff]   ;;  %v4431_v49 = vld [vmem:[#allocation16 + $0xc0] ss:$16 sps:$4 sm:$0xff]   ;;  %v4434_v39 = vld [vmem:[#allocation16 + $0xc8] ss:$16 sps:$4 sm:$0xff]  }
 0x28b   :  { %v2815_v54 = vpop.f32.mrb[88].mxu1  ;;  %v4439_v27 = vld [vmem:[#allocation16 + $0xe4] ss:$16 sps:$4 sm:$0xff]  }
 0x28c   :  { %v2739_v47 = vmax.f32 %v2738_v35, 0.0  ;;  %v2816_v28 = vadd.f32 %v3600_v59, %v2815_v54  ;;  %v4065_v60 = vpop.f32.mrb[89].mxu1  ;;  %v4415_v59 = vld [vmem:[#allocation16 + $0x64] ss:$16 sps:$4 sm:$0xff]   ;;  %v4440_v35 = vld [vmem:[#allocation16 + $0xe8] ss:$16 sps:$4 sm:$0xff]  }
 0x28d   :  { %3315 = vmatprep.subr.bf16.mxu1 %v4415_v59  ;;  %v3637_v54 = vld [vmem:[%s5296_s11] ss:$0 sm:$0xff]  ;;  %v3144_v59 = vrot.slane %v3127_v50, %v3143_v9  ;;  %s4698_s11 = smov [#allocation17]  }
 0x28e   :  { %v2740_v32 = vadd.f32 %v2739_v47, %v2654_v25  ;;  %v2824_v41 = vadd.f32 %v3627_v56, %v2816_v28  ;;  %3316 = vmatpush1.bf16.msra.mxu1 %v4413_v43  ;;  %v4437_v25 = vld [vmem:[#allocation16 + $0xe0] ss:$16 sps:$4 sm:$0xff]   ;;  %s3408_s26 = sshll.u32 %s4698_s11, 4  ;;  %s3409_s26 = int_to_ptr.vmem [resolvable:$true] %s3408_s26 }
 0x28f   :  { %3317 = vmatprep.subr.bf16.mxu1 %v4421_v12  ;;  %s4641_s13 = scalar_lea.vmem %s3409_s26, 1024  ;;  %p4646_p3 = scmp.lt.s32.totalorder %s3409_s26, %s3409_s26 }
 0x290   :  { %v2825_v10 = vmax.f32 %v2824_v41, 0.0  ;;  %p4642_p2 = scmp.ne.s32.totalorder %s3409_s26, %s4641_s13  ;;  %p4647_p4 = scmp.lt.s32.totalorder %s4641_s13, %s4641_s13 }
 0x292   :  { %v2826_v61 = vadd.f32 %v2825_v10, %v2740_v32  ;;  %3318 = vmatpush1.bf16.msra.mxu1 %v4419_v13  ;;  %p4648_p5 = por %p4647_p4, %p4646_p3 }
 0x293   :  { %3319 = vmatprep.subr.bf16.mxu1 %v4427_v63 }
 0x294   :  { %v2949_v52 = vrot.slane %v2826_v61, %v5175_v48  ;;  %p4649_p6 = pnand %p4648_p5, %p4642_p2 }
 0x296   :  { %3320 = vmatpush1.bf16.msra.mxu1 %v4425_v51  ;;  %v2950_v16 = vcombine.high %v2949_v52, %v2949_v52  ;;  %v2957_v36 = vrot.slane %v2949_v52, %v5175_v48 }
 0x297   :  { %3321 = vmatprep.subr.bf16.mxu1 %v4433_v20 }
 0x298   :  { %v2964_v4 = vrot.slane %v2950_v16, %v5175_v48  ;;  %v2968_v38 = vrot.slane %v2957_v36, %v5194_v57  ;;  %v4412_v48 = vld [vmem:[#allocation16 + $0x4c] ss:$16 sps:$4 sm:$0xff]  }
 0x29a   :  { %v2972_v26 = vrot.slane %v2964_v4, %v5194_v57  ;;  %3322 = vmatpush1.bf16.msra.mxu1 %v4431_v49 }
 0x29b   :  { %3323 = vmatprep.subr.bf16.mxu1 %v4439_v27 }
 0x29e   :  { %3324 = vmatpush1.bf16.msra.mxu1 %v4437_v25 }
 0x34c   :  { %v2933_v18 = vpop.f32.mrb[92].mxu1 }
 0x34d   :  { %v2934_v0 = vadd.f32 %v3628_v58, %v2933_v18  ;;  %v4084_v15 = vpop.f32.mrb[93].mxu1 }
 0x34e   :  { %v2936_v21 = vpop.f32.mrb[94].mxu1 }
 0x34f   :  { %v2940_v22 = vmax.f32 %v2934_v0, 0.0  ;;  %v2937_v62 = vadd.f32 %v3628_v58, %v2936_v21  ;;  %v4085_v2 = vpop.f32.mrb[95].mxu1 }
 0x351   :  { %v2975_v5 = vmul.f32 %v2968_v38, %v2940_v22  ;;  %v2941_v8 = vmax.f32 %v2937_v62, 0.0 }
 0x353   :  { %v2977_v29 = vadd.f32 %v2975_v5, %v2940_v22  ;;  %v2976_v33 = vmul.f32 %v2972_v26, %v2941_v8 }
 0x355   :  { %v2978_v34 = vadd.f32 %v2976_v33, %v2941_v8 }
 0x357   :  { %v2979_v40 = vpack.c.bf16 %v2978_v34, %v2977_v29 }
 0x359   :  { %4103 = vmatmul.mubr.bf16.vlgmr.msra.gmra.mrb[108].mxu0 %v2979_v40 }
 0x35a   :  { %3353 = vmatpush1.bf16.msra.mxu0 %v4398_v37  ;;  %3384 = vmatprep.mubr.bf16.mxu0 %v4692_v31  ;;  %v4436_v31 = vld [vmem:[#allocation16 + $0xcc] ss:$16 sps:$4 sm:$0xff]  }
 0x35b   :  { %3354 = vmatprep.subr.bf16.mxu0 %v4406_v19 }
 0x35e   :  { %3355 = vmatpush1.bf16.msra.mxu0 %v4404_v7 }
 0x35f   :  { %3356 = vmatprep.subr.bf16.mxu0 %v4412_v48 }
 0x362   :  { %3357 = vmatpush1.bf16.msra.mxu0 %v4410_v55 }
 0x363   :  { %3358 = vmatprep.subr.bf16.mxu0 %v4418_v17 }
 0x366   :  { %3359 = vmatpush1.bf16.msra.mxu0 %v4416_v24 }
 0x367   :  { %3360 = vmatprep.subr.bf16.mxu0 %v4424_v42 }
 0x36a   :  { %3361 = vmatpush1.bf16.msra.mxu0 %v4422_v44 }
 0x36b   :  { %3362 = vmatprep.subr.bf16.mxu0 %v4430_v45 }
 0x36e   :  { %3363 = vmatpush1.bf16.msra.mxu0 %v4428_v23 }
 0x36f   :  { %3364 = vmatprep.subr.bf16.mxu0 %v4436_v31 }
 0x372   :  { %3365 = vmatpush1.bf16.msra.mxu0 %v4434_v39 }
 0x373   :  { %3366 = vmatprep.subr.bf16.mxu0 %v4442_v53 }
 0x376   :  { %3367 = vmatpush1.bf16.msra.mxu0 %v4440_v35 }
 0x42c   :  { %v3085_v56 = vpop.f32.mrb[108].mxu0 }
 0x42d   :  { %v3086_v47 = vadd.f32 %v3637_v54, %v3085_v56  ;;  %v4104_v28 = vpop.f32.mrb[109].mxu0 }
 0x42e   :  { %v3088_v60 = vpop.f32.mrb[110].mxu0 }
 0x42f   :  { %v3089_v32 = vadd.f32 %v3637_v54, %v3088_v60  ;;  %v4105_v41 = vpop.f32.mrb[111].mxu0  ;;  %v3092_v10 = vmax.f32 %v3086_v47, 0.0 }
 0x431   :  { %v3093_v61 = vmax.f32 %v3089_v32, 0.0 }
 0x433   :  { %v3094_v1 = vpack.c.bf16 %v3093_v61, %v3092_v10 }
 0x435   :  { %3342 = vmatmul.mubr.bf16.vlgmr.msra.gmra.mrb[96].mxu1 %v3094_v1  ;;  %3385 = vmatmul.mubr.bf16.vlgmr.msra.gmra.mrb[112].mxu0 %v3094_v1 }
 0x508   :  { %v3343_v43 = vpop.f32.mrb[96].mxu1  ;;  %v3386_v12 = vpop.f32.mrb[112].mxu0 }
 0x509   :  { %v3344_v13 = vadd.f32 %v3343_v43, %v3132_v30  ;;  %v3387_v63 = vadd.f32 %v3386_v12, %v3140_v14  ;;  %v3345_v51 = vpop.f32.mrb[97].mxu1  ;;  %v3388_v52 = vpop.f32.mrb[113].mxu0 }
 0x50a   :  { %v3346_v16 = vadd.f32 %v3345_v51, %v3136_v46  ;;  %v3389_v58 = vadd.f32 %v3388_v52, %v3144_v59  ;;  %v3347_v36 = vpop.f32.mrb[98].mxu1  ;;  %v3390_v18 = vpop.f32.mrb[114].mxu0 }
 0x50b   :  { %3395 = vst [vmem:[#allocation17] sm:$0xff] %v3344_v13  ;;  %3397 = vst [vmem:[#allocation17 + $0x10] sm:$0xff] %v3387_v63  ;;  %v3348_v11 = vadd.f32 %v3347_v36, %v3132_v30  ;;  %v3391_v0 = vadd.f32 %v3390_v18, %v3140_v14  ;;  %v3349_v57 = vpop.f32.mrb[99].mxu1  ;;  %v3392_v15 = vpop.f32.mrb[115].mxu0 }
 0x50c   :  { %3396 = vst [vmem:[#allocation17 + $0x8] sm:$0xff] %v3346_v16  ;;  %3398 = vst [vmem:[#allocation17 + $0x18] sm:$0xff] %v3389_v58  ;;  %v3350_v4 = vadd.f32 %v3349_v57, %v3136_v46  ;;  %v3393_v21 = vadd.f32 %v3392_v15, %v3144_v59 }
 0x50d   :  { %3399 = vst [vmem:[#allocation17 + $0x20] sm:$0xff] %v3348_v11  ;;  %3401 = vst [vmem:[#allocation17 + $0x30] sm:$0xff] %v3391_v0 }
 0x50e   :  { %3400 = vst [vmem:[#allocation17 + $0x28] sm:$0xff] %v3350_v4  ;;  %3402 = vst [vmem:[#allocation17 + $0x38] sm:$0xff] %v3393_v21 }
 0x50f   :  { %4652 = shalt.err (!%p4649_p6)
}
 0x510   :  { %s4653_s7 = scalar_lea.hbm %s5299_s14, 1024 }
 0x511   :  { %p4654_p7 = scmp.ne.s32.totalorder %s5299_s14, %s4653_s7  ;;  %p4657_p8 = scmp.lt.u32.totalorder %s4653_s7, %s5299_s14 }
 0x513   :  { %p4659_p9 = pnand %p4657_p8, %p4654_p7 }
 0x515   :  { %4662 = shalt.err (!%p4659_p9)
}
 0x516   :  { %s4699_s15 = smov 512   ;;  %s4700_s23 = smov 32  }
 0x517   :  { %3414 = dma.vmem_to_hbm [thread:$0]  %s3409_s26, 1024, %s5299_s14, [#allocation4], %s4699_s15, %s4699_s15, %s4700_s23  }
 0x518   :  { %4673 = dma.done.wait [#allocation4], 1024  }
 0x519   :  { %4674 = vsyncadd [#allocation4], 4294966272 }
 0x51a   :  { %3418 = vsyncpa [#allocation3], 1 }
 0x51b   :  { %3419 = vsyncpa [#allocation6], 1 }
 0x51c   :  { %3420 = vsyncpa [#allocation9], 1 }
 0x51d   :  { %3421 = vsyncpa [#allocation12], 1 }
 0x51e   :  { %3422 = vsyncpa [#allocation15], 1 }
 0x51f   :  { %3423 = vsyncpa [#allocation4], 1 }

</bundles_post_ra>
